<compile_context>
chip_gen: v5e
topology: v5e:2x2
jax: 0.10.0
libtpu: 0.0.40
codegen_flags: <defaults>
</compile_context>

<pallas_src>
import jax
import jax.numpy as jnp
from jax.experimental import pallas as pl
from jax.experimental.pallas import tpu as pltpu


def _coupling_fwd_kernel(Ft_ref, yt_ref, mask_ref, inv_mask_ref,
                         W1Ft_ref, W1Yt_ref, b1_ref, W2t_ref, b2_ref,
                         xt_ref, ldj_ref):
    D = yt_ref.shape[0]

    Ft = Ft_ref[...].astype(jnp.float32)        # (F_dim, TB)  batch on lanes
    yt = yt_ref[...].astype(jnp.float32)        # (D, TB)
    mask = mask_ref[...]                        # (D, 1)  broadcast along lanes
    inv_mask = inv_mask_ref[...]                # (D, 1)  = 1 - mask (hoisted)

    # y1 = y * mask
    y1 = yt * mask

    # Fused first layers of map_s / map_t with the projection folded in:
    #   h^T = [Ws1F|Wt1F]^T @ F^T + [Wp@Ws1P|Wp@Wt1P]^T @ y1^T + b1^T   -> (2H, TB)
    h = (jnp.dot(W1Ft_ref[...], Ft, preferred_element_type=jnp.float32)
         + jnp.dot(W1Yt_ref[...], y1, preferred_element_type=jnp.float32)
         + b1_ref[...])
    h = jnp.maximum(h, 0.0)                     # ReLU on the (2H, TB) activations

    # Fused second layers (block-diag) with the ldj sum folded in as one extra row:
    #   rows [0:D) = s^T,  [D:2D) = t^T,  row 2D = -(sum_j s_j)  (remaining rows are padding)
    st = jnp.dot(W2t_ref[...], h, preferred_element_type=jnp.float32) + b2_ref[...]
    s = st[:D, :]
    t = st[D:2 * D, :]
    ldj = st[2 * D:2 * D + 1, :]                # (1, TB), already lane-dense

    # x = y1 + (1 - mask) * ((y - t) * exp(-s))
    x = y1 + inv_mask * ((yt - t) * jnp.exp(-s))
    xt_ref[...] = x.astype(xt_ref.dtype)
    ldj_ref[...] = ldj.astype(ldj_ref.dtype)


def _round_up(a, m):
    return -(-a // m) * m


def _pick_tile_b(B, tile_b):
    tb = max(128, (min(tile_b, 4096) // 128) * 128)     # lane tile: multiple of 128
    tb = min(tb, max(128, _round_up(B, 128)))            # don't exceed the (rounded) batch
    if B > 128:
        # keep >= 2 grid steps so both v7x TensorCores get work on the parallel axis
        tb = min(tb, max(128, ((B - 1) // 128) * 128))
    return tb


def coupling_layer_forward(F, y, mask, params, *, tile_b=2048):
    """Forward pass. Weight folding/fusion and layout plumbing happen once at trace time."""
    B, F_dim = F.shape
    _, D = y.shape
    (Wp, bp, Ws1F, Ws1P, bs1, Ws2, bs2, Wt1F, Wt1P, bt1, Wt2, bt2) = params
    H = Ws1F.shape[1]
    f32 = jnp.float32

    # --- trace-time weight folding / fusion (exactly equivalent algebra) ----------------
    Wys = (Wp @ Ws1P).astype(f32)                       # projection folded into map_s L1
    Wyt = (Wp @ Wt1P).astype(f32)                       # projection folded into map_t L1
    b1s = (bs1 + bp @ Ws1P).astype(f32)
    b1t = (bt1 + bp @ Wt1P).astype(f32)
    W1Ft = jnp.concatenate([Ws1F, Wt1F], axis=1).astype(f32).T      # (2H, F_dim)
    W1Yt = jnp.concatenate([Wys, Wyt], axis=1).T                     # (2H, D)
    b1 = jnp.concatenate([b1s, b1t]).reshape(2 * H, 1)

    # Block-diag second layer + ldj column (-Ws2.sum(1), bias -sum(bs2)),
    # output rows padded to a multiple of 8 for clean sublane alignment.
    n_out = _round_up(2 * D + 1, 8)
    W2e = jnp.zeros((2 * H, n_out), f32)
    W2e = W2e.at[:H, :D].set(Ws2.astype(f32))
    W2e = W2e.at[H:, D:2 * D].set(Wt2.astype(f32))
    W2e = W2e.at[:H, 2 * D].set(-jnp.sum(Ws2.astype(f32), axis=1))
    b2e = jnp.zeros((n_out,), f32)
    b2e = b2e.at[:D].set(bs2).at[D:2 * D].set(bt2).at[2 * D].set(-jnp.sum(bs2))
    W2t = W2e.T                                        # (n_out, 2H)
    b2t = b2e.reshape(n_out, 1)

    mask_c = mask.reshape(D, 1).astype(f32)
    inv_mask_c = 1.0 - mask_c                          # hoisted out of the kernel

    # --- batch-on-lanes layout (layout plumbing; avoidable if caller is feature-major) --
    Ft = F.T                                           # (F_dim, B)
    yt = y.T                                           # (D, B)

    tb = _pick_tile_b(B, tile_b)
    n_steps = pl.cdiv(B, tb)       # no padding copies: Pallas masks the partial last block

    col = lambda r: pl.BlockSpec((r, tb), lambda i: (0, i))
    full = lambda shape: pl.BlockSpec(shape, lambda i: (0, 0))

    xt, ldj = pl.pallas_call(
        _coupling_fwd_kernel,
        out_shape=(jax.ShapeDtypeStruct((D, B), y.dtype),
                   jax.ShapeDtypeStruct((1, B), jnp.float32)),
        grid_spec=pltpu.PrefetchScalarGridSpec(
            num_scalar_prefetch=0,
            grid=(n_steps,),
            in_specs=[
                col(F_dim),                 # F^T
                col(D),                     # y^T
                full((D, 1)),               # mask
                full((D, 1)),               # 1 - mask
                full((2 * H, F_dim)),       # fused L1 weights (F part), transposed
                full((2 * H, D)),           # fused L1 weights (y1 part, proj folded), transposed
                full((2 * H, 1)),           # fused L1 bias
                full((n_out, 2 * H)),       # block-diag L2 weights + ldj row, transposed
                full((n_out, 1)),           # fused L2 bias + ldj bias (+ padding rows)
            ],
            out_specs=[col(D),              # x^T  (lane-dense, unmasked stores)
                       col(1)],             # ldj  (1, B) lane-dense row, no in-kernel reduce
        ),
        compiler_params=pltpu.CompilerParams(dimension_semantics=("parallel",)),
    )(Ft, yt, mask_c, inv_mask_c, W1Ft, W1Yt, b1, W2t, b2t)

    return xt.T, ldj.reshape(B)


def reference_forward(F, y, mask, params):
    (Wp, bp, Ws1F, Ws1P, bs1, Ws2, bs2, Wt1F, Wt1P, bt1, Wt2, bt2) = params
    y1 = y * mask
    proj = y1 @ Wp + bp
    F_y1 = jnp.concatenate([F, proj], axis=-1)
    W_s1 = jnp.concatenate([Ws1F, Ws1P], axis=0)
    W_t1 = jnp.concatenate([Wt1F, Wt1P], axis=0)
    s = jnp.maximum(F_y1 @ W_s1 + bs1, 0.0) @ Ws2 + bs2
    t = jnp.maximum(F_y1 @ W_t1 + bt1, 0.0) @ Wt2 + bt2
    x = y1 + (1.0 - mask) * ((y - t) * jnp.exp(-s))
    ldj = jnp.sum(-s, axis=-1)
    return x, ldj


if __name__ == "__main__":
    # Small shapes consistent with the module. B is deliberately NOT a multiple of the
    # lane tile so the partial-last-block path (no wrapper padding) is exercised, and
    # large enough that the grid has >= 2 parallel steps.
    B, F_dim, D, P, H = 300, 32, 16, 16, 32

    key = jax.random.PRNGKey(0)
    ks = jax.random.split(key, 14)
    scale = 0.1

    F = jax.random.normal(ks[0], (B, F_dim), jnp.float32)
    y = jax.random.normal(ks[1], (B, D), jnp.float32)
    mask = (jnp.arange(D) % 2).astype(jnp.float32)      # alternating checkerboard mask

    params = (
        scale * jax.random.normal(ks[2], (D, P), jnp.float32),       # Wp
        scale * jax.random.normal(ks[3], (P,), jnp.float32),         # bp
        scale * jax.random.normal(ks[4], (F_dim, H), jnp.float32),   # Ws1 (F part)
        scale * jax.random.normal(ks[5], (P, H), jnp.float32),       # Ws1 (proj part)
        scale * jax.random.normal(ks[6], (H,), jnp.float32),         # bs1
        scale * jax.random.normal(ks[7], (H, D), jnp.float32),       # Ws2
        scale * jax.random.normal(ks[8], (D,), jnp.float32),         # bs2
        scale * jax.random.normal(ks[9], (F_dim, H), jnp.float32),   # Wt1 (F part)
        scale * jax.random.normal(ks[10], (P, H), jnp.float32),      # Wt1 (proj part)
        scale * jax.random.normal(ks[11], (H,), jnp.float32),        # bt1
        scale * jax.random.normal(ks[12], (H, D), jnp.float32),      # Wt2
        scale * jax.random.normal(ks[13], (D,), jnp.float32),        # bt2
    )

    x, ldj = coupling_layer_forward(F, y, mask, params, tile_b=2048)
    jax.block_until_ready((x, ldj))

    x_ref, ldj_ref = reference_forward(F, y, mask, params)
    assert x.shape == (B, D) and ldj.shape == (B,)
    assert jnp.allclose(x, x_ref, atol=1e-4, rtol=1e-4)
    assert jnp.allclose(ldj, ldj_ref, atol=1e-4, rtol=1e-4)

    print("KERNEL_OK")
</pallas_src>

<mosaic_0001>
module attributes {stable_mosaic.version = 11 : i64} {
  func.func @_coupling_fwd_kernel(%arg0: i32, %arg1: memref<32x256xf32, #tpu.memory_space<vmem>>, %arg2: memref<16x256xf32, #tpu.memory_space<vmem>>, %arg3: memref<16x1xf32, #tpu.memory_space<vmem>>, %arg4: memref<16x1xf32, #tpu.memory_space<vmem>>, %arg5: memref<64x32xf32, #tpu.memory_space<vmem>>, %arg6: memref<64x16xf32, #tpu.memory_space<vmem>>, %arg7: memref<64x1xf32, #tpu.memory_space<vmem>>, %arg8: memref<40x64xf32, #tpu.memory_space<vmem>>, %arg9: memref<40x1xf32, #tpu.memory_space<vmem>>, %arg10: memref<16x256xf32, #tpu.memory_space<vmem>>, %arg11: memref<1x256xf32, #tpu.memory_space<vmem>>) attributes {dimension_semantics = [#tpu.dimension_semantics<parallel>], iteration_bounds = array<i64: 2>, scalar_prefetch = 0 : i64, scratch_operands = 0 : i64, tpu.core_type = #tpu.core_type<tc>, window_params = [{transform_indices = @transform_0, window_bounds = array<i64: 32, 256>}, {transform_indices = @transform_1, window_bounds = array<i64: 16, 256>}, {pipeline_mode = #tpu.pipeline_mode<synchronous>, transform_indices = @transform_2, window_bounds = array<i64: 16, 1>}, {pipeline_mode = #tpu.pipeline_mode<synchronous>, transform_indices = @transform_3, window_bounds = array<i64: 16, 1>}, {pipeline_mode = #tpu.pipeline_mode<synchronous>, transform_indices = @transform_4, window_bounds = array<i64: 64, 32>}, {pipeline_mode = #tpu.pipeline_mode<synchronous>, transform_indices = @transform_5, window_bounds = array<i64: 64, 16>}, {pipeline_mode = #tpu.pipeline_mode<synchronous>, transform_indices = @transform_6, window_bounds = array<i64: 64, 1>}, {pipeline_mode = #tpu.pipeline_mode<synchronous>, transform_indices = @transform_7, window_bounds = array<i64: 40, 64>}, {pipeline_mode = #tpu.pipeline_mode<synchronous>, transform_indices = @transform_8, window_bounds = array<i64: 40, 1>}, {transform_indices = @transform_9, window_bounds = array<i64: 16, 256>}, {transform_indices = @transform_10, window_bounds = array<i64: 1, 256>}]} {
    %c0 = arith.constant 0 : index
    %c0_0 = arith.constant 0 : index
    %0 = vector.load %arg1[%c0, %c0_0] : memref<32x256xf32, #tpu.memory_space<vmem>>, vector<32x256xf32>
    %c0_1 = arith.constant 0 : index
    %c0_2 = arith.constant 0 : index
    %1 = vector.load %arg2[%c0_1, %c0_2] : memref<16x256xf32, #tpu.memory_space<vmem>>, vector<16x256xf32>
    %c0_3 = arith.constant 0 : index
    %c0_4 = arith.constant 0 : index
    %2 = vector.load %arg3[%c0_3, %c0_4] : memref<16x1xf32, #tpu.memory_space<vmem>>, vector<16x1xf32>
    %c0_5 = arith.constant 0 : index
    %c0_6 = arith.constant 0 : index
    %3 = vector.load %arg4[%c0_5, %c0_6] : memref<16x1xf32, #tpu.memory_space<vmem>>, vector<16x1xf32>
    %4 = vector.broadcast %2 : vector<16x1xf32> to vector<16x256xf32>
    %5 = arith.mulf %1, %4 : vector<16x256xf32>
    %c0_7 = arith.constant 0 : index
    %c0_8 = arith.constant 0 : index
    %6 = vector.load %arg5[%c0_7, %c0_8] : memref<64x32xf32, #tpu.memory_space<vmem>>, vector<64x32xf32>
    %cst = arith.constant dense<0.000000e+00> : vector<64x256xf32>
    %7 = tpu.matmul %6, %0, %cst {dimension_numbers = #tpu.dot_dimension_numbers<[1], [0], [0], [1], [0, 0, 1, 1], [], []>} : vector<64x32xf32>, vector<32x256xf32>, vector<64x256xf32> -> vector<64x256xf32>
    %c0_9 = arith.constant 0 : index
    %c0_10 = arith.constant 0 : index
    %8 = vector.load %arg6[%c0_9, %c0_10] : memref<64x16xf32, #tpu.memory_space<vmem>>, vector<64x16xf32>
    %cst_11 = arith.constant dense<0.000000e+00> : vector<64x256xf32>
    %9 = tpu.matmul %8, %5, %cst_11 {dimension_numbers = #tpu.dot_dimension_numbers<[1], [0], [0], [1], [0, 0, 1, 1], [], []>} : vector<64x16xf32>, vector<16x256xf32>, vector<64x256xf32> -> vector<64x256xf32>
    %10 = arith.addf %7, %9 : vector<64x256xf32>
    %c0_12 = arith.constant 0 : index
    %c0_13 = arith.constant 0 : index
    %11 = vector.load %arg7[%c0_12, %c0_13] : memref<64x1xf32, #tpu.memory_space<vmem>>, vector<64x1xf32>
    %12 = vector.broadcast %11 : vector<64x1xf32> to vector<64x256xf32>
    %13 = arith.addf %10, %12 : vector<64x256xf32>
    %cst_14 = arith.constant 0.000000e+00 : f32
    %14 = vector.broadcast %cst_14 : f32 to vector<64x256xf32>
    %15 = arith.maximumf %13, %14 : vector<64x256xf32>
    %c0_15 = arith.constant 0 : index
    %c0_16 = arith.constant 0 : index
    %16 = vector.load %arg8[%c0_15, %c0_16] : memref<40x64xf32, #tpu.memory_space<vmem>>, vector<40x64xf32>
    %cst_17 = arith.constant dense<0.000000e+00> : vector<40x256xf32>
    %17 = tpu.matmul %16, %15, %cst_17 {dimension_numbers = #tpu.dot_dimension_numbers<[1], [0], [0], [1], [0, 0, 1, 1], [], []>} : vector<40x64xf32>, vector<64x256xf32>, vector<40x256xf32> -> vector<40x256xf32>
    %c0_18 = arith.constant 0 : index
    %c0_19 = arith.constant 0 : index
    %18 = vector.load %arg9[%c0_18, %c0_19] : memref<40x1xf32, #tpu.memory_space<vmem>>, vector<40x1xf32>
    %19 = vector.broadcast %18 : vector<40x1xf32> to vector<40x256xf32>
    %20 = arith.addf %17, %19 : vector<40x256xf32>
    %21 = vector.extract_strided_slice %20 {offsets = [0, 0], sizes = [16, 256], strides = [1, 1]} : vector<40x256xf32> to vector<16x256xf32>
    %22 = vector.extract_strided_slice %20 {offsets = [16, 0], sizes = [16, 256], strides = [1, 1]} : vector<40x256xf32> to vector<16x256xf32>
    %23 = vector.extract_strided_slice %20 {offsets = [32, 0], sizes = [1, 256], strides = [1, 1]} : vector<40x256xf32> to vector<1x256xf32>
    %24 = arith.subf %1, %22 : vector<16x256xf32>
    %cst_20 = arith.constant 0.000000e+00 : f32
    %25 = vector.broadcast %cst_20 : f32 to vector<16x256xf32>
    %26 = arith.subf %25, %21 : vector<16x256xf32>
    %27 = math.exp %26 : vector<16x256xf32>
    %28 = arith.mulf %24, %27 : vector<16x256xf32>
    %29 = vector.broadcast %3 : vector<16x1xf32> to vector<16x256xf32>
    %30 = arith.mulf %29, %28 : vector<16x256xf32>
    %31 = arith.addf %5, %30 : vector<16x256xf32>
    %c0_21 = arith.constant 0 : index
    %c0_22 = arith.constant 0 : index
    %32 = vector.load %arg10[%c0_21, %c0_22] : memref<16x256xf32, #tpu.memory_space<vmem>>, vector<16x256xf32>
    tpu.vector_store %arg10[%c0_21, %c0_22], %31 {strides = array<i32>} : memref<16x256xf32, #tpu.memory_space<vmem>>, vector<16x256xf32>,
    %c0_23 = arith.constant 0 : index
    %c0_24 = arith.constant 0 : index
    %33 = vector.load %arg11[%c0_23, %c0_24] : memref<1x256xf32, #tpu.memory_space<vmem>>, vector<1x256xf32>
    tpu.vector_store %arg11[%c0_23, %c0_24], %23 {strides = array<i32>} : memref<1x256xf32, #tpu.memory_space<vmem>>, vector<1x256xf32>,
    return
  }
  func.func @transform_0(%arg0: i32) -> (i32, i32) {
    %c0_i32 = arith.constant 0 : i32
    %c0_i32_0 = arith.constant 0 : i32
    return %c0_i32, %arg0 : i32, i32
  }
  func.func @transform_1(%arg0: i32) -> (i32, i32) {
    %c0_i32 = arith.constant 0 : i32
    %c0_i32_0 = arith.constant 0 : i32
    return %c0_i32, %arg0 : i32, i32
  }
  func.func @transform_2(%arg0: i32) -> (i32, i32) {
    %c0_i32 = arith.constant 0 : i32
    %c0_i32_0 = arith.constant 0 : i32
    %c0_i32_1 = arith.constant 0 : i32
    return %c0_i32, %c0_i32_0 : i32, i32
  }
  func.func @transform_3(%arg0: i32) -> (i32, i32) {
    %c0_i32 = arith.constant 0 : i32
    %c0_i32_0 = arith.constant 0 : i32
    %c0_i32_1 = arith.constant 0 : i32
    return %c0_i32, %c0_i32_0 : i32, i32
  }
  func.func @transform_4(%arg0: i32) -> (i32, i32) {
    %c0_i32 = arith.constant 0 : i32
    %c0_i32_0 = arith.constant 0 : i32
    %c0_i32_1 = arith.constant 0 : i32
    return %c0_i32, %c0_i32_0 : i32, i32
  }
  func.func @transform_5(%arg0: i32) -> (i32, i32) {
    %c0_i32 = arith.constant 0 : i32
    %c0_i32_0 = arith.constant 0 : i32
    %c0_i32_1 = arith.constant 0 : i32
    return %c0_i32, %c0_i32_0 : i32, i32
  }
  func.func @transform_6(%arg0: i32) -> (i32, i32) {
    %c0_i32 = arith.constant 0 : i32
    %c0_i32_0 = arith.constant 0 : i32
    %c0_i32_1 = arith.constant 0 : i32
    return %c0_i32, %c0_i32_0 : i32, i32
  }
  func.func @transform_7(%arg0: i32) -> (i32, i32) {
    %c0_i32 = arith.constant 0 : i32
    %c0_i32_0 = arith.constant 0 : i32
    %c0_i32_1 = arith.constant 0 : i32
    return %c0_i32, %c0_i32_0 : i32, i32
  }
  func.func @transform_8(%arg0: i32) -> (i32, i32) {
    %c0_i32 = arith.constant 0 : i32
    %c0_i32_0 = arith.constant 0 : i32
    %c0_i32_1 = arith.constant 0 : i32
    return %c0_i32, %c0_i32_0 : i32, i32
  }
  func.func @transform_9(%arg0: i32) -> (i32, i32) {
    %c0_i32 = arith.constant 0 : i32
    %c0_i32_0 = arith.constant 0 : i32
    return %c0_i32, %arg0 : i32, i32
  }
  func.func @transform_10(%arg0: i32) -> (i32, i32) {
    %c0_i32 = arith.constant 0 : i32
    %c0_i32_0 = arith.constant 0 : i32
    return %c0_i32, %arg0 : i32, i32
  }
}

</mosaic_0001>

<bundles_post_ra>
// kernel: tpu_custom_call.1
= control target key start
LH: loop header
LB: loop body
LE: loop exit
PB: predicated region body
PF: predicated region fallthrough
CT: control target
= control target key end

     0   :  { %s3574_s0 = inlined_call_operand.vmem [shape: f32[32,300], index: 0, kind: input, shape index: {}]   ;;  %s3575_s1 = inlined_call_operand.vmem [shape: f32[16,300], index: 1, kind: input, shape index: {}]   ;;  %s3576_s2 = inlined_call_operand.vmem [shape: f32[16,1], index: 2, kind: input, shape index: {}]   ;;  %s3577_s3 = inlined_call_operand.vmem [shape: f32[16,1], index: 3, kind: input, shape index: {}]   ;;  %s3578_s4 = inlined_call_operand.vmem [shape: f32[64,32], index: 4, kind: input, shape index: {}]   ;;  %s3579_s5 = inlined_call_operand.vmem [shape: f32[64,16], index: 5, kind: input, shape index: {}]   ;;  %s3580_s6 = inlined_call_operand.vmem [shape: f32[64,1], index: 6, kind: input, shape index: {}]   ;;  %s3581_s7 = inlined_call_operand.vmem [shape: f32[40,64], index: 7, kind: input, shape index: {}]   ;;  %s3582_s8 = inlined_call_operand.vmem [shape: f32[40,1], index: 8, kind: input, shape index: {}]   ;;  %s3583_s9 = inlined_call_operand.hbm [shape: f32[16,300], index: 9, kind: output, shape index: {0}]   ;;  %s3584_s10 = inlined_call_operand.hbm [shape: f32[1,300], index: 10, kind: output, shape index: {1}]  }
   0x1   :  { %3596 = sst [smem:[#allocation16_spill]] %s3574_s0 }
   0x2   :  { %3597 = sst [smem:[#allocation17_spill]] %s3583_s9 }
   0x3   :  { %3598 = sst [smem:[#allocation18_spill]] %s3584_s10 }
   0x4   :  { %16 = vsyncpa [#allocation5], 0 }
   0x5   :  { %18 = vsyncpa [#allocation5 + $0x1], 0 }
   0x6   :  { %19 = vsyncpa [#allocation7], 0 }
   0x7   :  { %21 = vsyncpa [#allocation7 + $0x1], 0  ;;  %s2721_s13 = smov 0   ;;  %s2723_s14 = smov 0  }
   0x8   :  { %s2725_s15 = smov 0   ;;  %s2727_s16 = smov 0  }
   0x9 LB: > { %3599 = sst [smem:[#allocation10_spill]] %s2515_s13  ;;  %s2742_s17 = sadd.s32 4294967295, %s2527_s16   ;;  %s2527_s16 = sphi %s2727_s16, %s3647_s16   ;;  %s2523_s15 = sphi %s2725_s15, %s3651_s15   ;;  %s2519_s14 = sphi %s2723_s14, %s3650_s14   ;;  %s2515_s13 = sphi %s2721_s13, %s3649_s13  }
   0xa   : > { %3600 = sst [smem:[#allocation11_spill]] %s2742_s17  ;;  %s1829_s18 = sadd.s32 4294967294, %s2527_s16  }
   0xb   : > { %s2746_s19 = sadd.s32 1, %s2527_s16   ;;  %s34_s20 = sadd.s32 1, %s2523_s15 }
   0xc   : > { %3601 = sst [smem:[#allocation12_spill]] %s2746_s19  ;;  %s31_s21 = ssub.s32 %s2527_s16, %s2746_s19 }
   0xd   : > { %p41_p0 = scmp.ne.s32.totalorder %s2523_s15, %s2519_s14  ;;  %p32_p1 = scmp.eq.s32.totalorder %s31_s21, 0 }
   0xe   : > { %p42_p2 = scmp.eq.s32.totalorder %s2527_s16, 0  ;;  %p244_p3 = scmp.eq.s32.totalorder %s2742_s17, 1 }
   0xf   : > { %p249_p4 = scmp.ne.s32.totalorder %s2519_s14, %s2515_s13  ;;  %p250_p7 = scmp.eq.s32.totalorder %s1829_s18, 1 }
  0x10   : > { %s2758_s22 = scalar_select %p32_p1, %s2523_s15, %s34_s20  }
  0x11   : > { %p2760_p5 = por %p42_p2, %p41_p0  ;;  %p2764_p6 = por %p244_p3, %p41_p0 }
  0x12   : > { %3602 = sst [smem:[#allocation13_spill]] %s2758_s22  ;;  %p2768_p8 = por %p250_p7, %p249_p4 }
  0x13   : > { %s3604_s24 = scalar_select %p2764_p6, 1, 0 }
  0x14   : > { %s3606_s25 = scalar_select %p2768_p8, 1, 0 }
  0x15   : > { %3605 = sst [smem:[#allocation14_spill]] %s3604_s24  ;;  %p1831_p9 = scmp.ge.s32.totalorder %s2527_s16, 2 }
  0x16   : > { %3607 = sst [smem:[#allocation15_spill]] %s3606_s25 }
  0x17   : > { %313 = sbr.rel (%p1831_p9) target bundleno = 278 (0x116), region = 44 }
  0x1c   : > { %316 = sbr.rel (!%p2760_p5) target bundleno = 151 (0x97), region = 48  ;;  %s318_s26 = sand.u32 (%p2760_p5), 1, %s2523_s15  }
  0x1d   : > { %s1833_s27 = sshll.u32 (%p2760_p5), %s2527_s16, 1  ;;  %s1832_s28 = sshll.u32 (%p2760_p5), %s318_s26, 6 }
  0x1e   : > { %s322_s29 = ssub.s32 (%p2760_p5), 3, %s1833_s27  ;;  %s1950_s30 = sshll.u32 (%p2760_p5), %s2527_s16, 4 }
  0x1f   : > { %p323_p10 = scmp.lt.s32.totalorder (%p2760_p5), %s322_s29, 2  ;;  %s3608_s0 = sld [smem:[#allocation16_spill]] (%p2760_p5) }
  0x20   : > { %s2787_s22 = scalar_lea.vmem (%p2760_p5), [#allocation2], %s1832_s28  }
  0x21   : > { %s3653_s29 = smov (!%p323_p10, %s322_s29), 2 }
  0x22   : > { %s1834_s20 = sshll.u32 %s3653_s29, 5  ;;  %s2785_s21 = sshll.u32 %s3653_s29, 3 }
  0x23   : > { %p1838_p11 = scmp.eq.s32.totalorder %s1834_s20, 0 }
  0x24   : > { %p333_p12 = scmp.lt.u32.totalorder (!%p1838_p11), %s2785_s21, 8 }
  0x25   : > { %s2783_s18 = scalar_lea.vmem %s3608_s0, %s1950_s30   ;;  %332 = sbr.rel (%p1838_p11) target bundleno = 151 (0x97), region = 52 }
  0x2a   : > { %336 = sbr.rel (%p333_p12) target bundleno = 139 (0x8b), region = 56  ;;  %s2791_s26 = sand.u32 (!%p333_p12), 7, %s2785_s21  }
  0x2b   : > { %p359_p13 = scmp.eq.s32.totalorder (!%p333_p12), %s2791_s26, 0  ;;  %p1839_p0 = scmp.ne.s32.totalorder (!%p333_p12), %s2791_s26, 0 }
  0x2f   : > { %362 = sbr.rel (%p1839_p0) target bundleno = 89 (0x59), region = 71  ;;  %s3585_s27 = sshrl.u32 (!%p1839_p0), %s2785_s21, 3 }
  0x30   : > { %s2798_s29 = sshrl.u32 (!%p1839_p0), %s3585_s27, 3 }
  0x31   : > { %p1840_p1 = scmp.le.s32.totalorder (!%p1839_p0), %s2798_s29, 0 }
  0x34   : > { %1686 = sbr.rel (%p1840_p1) target bundleno = 72 (0x48), region = 283  ;;  %s3609_s28 = smov (!%p1840_p1), %s2787_s22 }
  0x35   : > { %s3610_s30 = smov (!%p1840_p1), %s2783_s18  ;;  %s2807_s11 = smov (!%p1840_p1), 0  }
  0x36   : > { %s2809_s12 = smov (!%p1840_p1), 0  }
  0x39 LB: >> { %v380_v0 = vld [vmem:[%s2535_s30 + $0x18] sm:$0xff]  ;;  %v396_v1 = vld [vmem:[%s2535_s30 + $0x30] sm:$0xff]  ;;  %v374_v2 = vld [vmem:[%s2535_s30] sm:$0xff]  ;;  %s438_s20 = sadd.s32 1, %s2539_s11  ;;  %s368_s12 = sadd.s32 1, %s2543_s12   ;;  %s2543_s12 = sphi %s2809_s12, %s368_s12   ;;  %s2539_s11 = sphi %s2807_s11, %s3613_s11   ;;  %s2535_s30 = sphi %s3610_s30, %s3612_s30   ;;  %s2531_s28 = sphi %s3609_s28, %s3611_s28  }
  0x3a   : >> { %391 = vst [vmem:[%s2531_s28 + $0x10] sm:$0xff] %v380_v0  ;;  %v376_v3 = vld [vmem:[%s2535_s30 + $0x8] sm:$0xff]  ;;  %v392_v4 = vld [vmem:[%s2535_s30 + $0x20] sm:$0xff]  ;;  %v408_v5 = vld [vmem:[%s2535_s30 + $0x38] sm:$0xff]  ;;  %p439_p2 = scmp.ge.s32.totalorder %s438_s20, %s2798_s29  ;;  %p367_p3 = scmp.ge.s32.totalorder %s368_s12, %s2798_s29 }
  0x3b   : >> { %407 = vst [vmem:[%s2531_s28 + $0x20] sm:$0xff] %v396_v1  ;;  %v402_v6 = vld [vmem:[%s2535_s30 + $0x48] sm:$0xff]  ;;  %v404_v7 = vld [vmem:[%s2535_s30 + $0x50] sm:$0xff]  ;;  %v416_v8 = vld [vmem:[%s2535_s30 + $0x58] sm:$0xff] }
  0x3c   : >> { %375 = vst [vmem:[%s2531_s28] sm:$0xff] %v374_v2  ;;  %s3655_s20 = smov (%p439_p2, %s438_s20), 0  ;;  %v418_v9 = vld [vmem:[%s2535_s30 + $0x60] sm:$0xff]  ;;  %v420_v10 = vld [vmem:[%s2535_s30 + $0x68] sm:$0xff]  ;;  %v432_v11 = vld [vmem:[%s2535_s30 + $0x70] sm:$0xff] }
  0x3d   : >> { %377 = vst [vmem:[%s2531_s28 + $0x8] sm:$0xff] %v376_v3  ;;  %s1841_s11 = sshll.u32 %s3655_s20, 6  ;;  %v434_v12 = vld [vmem:[%s2535_s30 + $0x78] sm:$0xff]  ;;  %v436_v13 = vld [vmem:[%s2535_s30 + $0x80] sm:$0xff] }
  0x3e   : >> { %393 = vst [vmem:[%s2531_s28 + $0x18] sm:$0xff] %v392_v4  ;;  %s443_s27 = scalar_lea.vmem %s2783_s18, %s1841_s11   ;;  %s444_s0 = scalar_lea.vmem %s2787_s22, %s1841_s11 [#allocation2]  }
  0x3f   : >> { %409 = vst [vmem:[%s2531_s28 + $0x28] sm:$0xff] %v408_v5  ;;  %s3612_s30 = smov %s443_s27  ;;  %s3613_s11 = smov %s3655_s20 }
  0x40   : >> { %423 = vst [vmem:[%s2531_s28 + $0x30] sm:$0xff] %v402_v6 }
  0x41   : >> { %425 = vst [vmem:[%s2531_s28 + $0x38] sm:$0xff] %v404_v7 }
  0x42   : >> { %427 = vst [vmem:[%s2531_s28 + $0x40] sm:$0xff] %v416_v8 }
  0x43   : >> { %429 = vst [vmem:[%s2531_s28 + $0x48] sm:$0xff] %v418_v9  ;;  %370 = sbr.rel (!%p367_p3) target bundleno = 57 (0x39), region = 289 }
  0x44   : >> { %431 = vst [vmem:[%s2531_s28 + $0x50] sm:$0xff] %v420_v10 }
  0x45   : >> { %433 = vst [vmem:[%s2531_s28 + $0x58] sm:$0xff] %v432_v11 }
  0x46   : >> { %435 = vst [vmem:[%s2531_s28 + $0x60] sm:$0xff] %v434_v12 }
  0x47   : >> { %437 = vst [vmem:[%s2531_s28 + $0x68] sm:$0xff] %v436_v13  ;;  %s3611_s28 = smov %s444_s0 }
  0x48 PF: > { %s3614_s19 = sshrl.u32 %s2785_s21, 3  ;;  %s1951_s13 = sshll.u32 %s2798_s29, 6 }
  0x49   : > { %s2864_s25 = sand.u32 7, %s3614_s19   ;;  %s2868_s10 = scalar_lea.vmem %s2783_s18, %s1951_s13  }
  0x4a   : > { %s2871_s9 = scalar_lea.vmem %s2787_s22, %s1951_s13 [#allocation2]   ;;  %p1846_p4 = scmp.le.s32.totalorder %s2864_s25, 0 }
  0x4b   : > { %s3615_s0 = smov (!%p1846_p4), %s2871_s9  ;;  %s3616_s27 = smov (!%p1846_p4), %s2868_s10 }
  0x4c   : > { %1700 = sbr.rel (%p1846_p4) target bundleno = 89 (0x59), region = 294  ;;  %s2880_s28 = smov (!%p1846_p4), 0  }
  0x4d   : > { %s2557_s30 = smov (!%p1846_p4), 0  }
  0x51 LB: >> { %v461_v14 = vld [vmem:[%s2551_s27] sm:$0xff]  ;;  %v463_v15 = vld [vmem:[%s2551_s27 + $0x18] sm:$0xff]  ;;  %v465_v16 = vld [vmem:[%s2551_s27 + $0x30] sm:$0xff]  ;;  %s469_s13 = sadd.s32 1, %s2555_s28  ;;  %s455_s30 = sadd.s32 1, %s2559_s30   ;;  %s2559_s30 = sphi %s2557_s30, %s455_s30   ;;  %s2555_s28 = sphi %s2880_s28, %s3617_s28   ;;  %s2551_s27 = sphi %s3616_s27, %s474_s27   ;;  %s2547_s0 = sphi %s3615_s0, %s475_s0  }
  0x52   : >> { %462 = vst [vmem:[%s2547_s0] sm:$0xff] %v461_v14  ;;  %v467_v17 = vld [vmem:[%s2551_s27 + $0x48] sm:$0xff]  ;;  %p470_p7 = scmp.ge.s32.totalorder %s469_s13, %s2864_s25  ;;  %p454_p10 = scmp.ge.s32.totalorder %s455_s30, %s2864_s25 }
  0x53   : >> { %464 = vst [vmem:[%s2547_s0 + $0x10] sm:$0xff] %v463_v15 }
  0x54   : >> { %466 = vst [vmem:[%s2547_s0 + $0x20] sm:$0xff] %v465_v16  ;;  %s3657_s13 = smov (%p470_p7, %s469_s13), 0  ;;  %457 = sbr.rel (!%p454_p10) target bundleno = 81 (0x51), region = 300 }
  0x55   : >> { %468 = vst [vmem:[%s2547_s0 + $0x30] sm:$0xff] %v467_v17  ;;  %s1847_s19 = sshll.u32 %s3657_s13, 3  ;;  %s3617_s28 = smov %s3657_s13 }
  0x56   : >> { %s474_s27 = scalar_lea.vmem %s2868_s10, %s1847_s19   ;;  %s475_s0 = scalar_lea.vmem %s2871_s9, %s1847_s19 [#allocation2]  }
  0x59 PF: > { %478 = sbr.rel (%p359_p13) target bundleno = 139 (0x8b), region = 89  ;;  %s480_s29 = ssub.s32 (!%p359_p13), %s2785_s21, %s2791_s26 }
  0x5a   : > { %s484_s12 = sshrl.u32 (!%p359_p13), %s2785_s21, 3  ;;  %s2901_s20 = scalar_lea.vmem (!%p359_p13), %s2783_s18, %s480_s29 }
  0x5b   : > { %s2904_s11 = scalar_lea.vmem (!%p359_p13), %s2787_s22, %s480_s29 [#allocation2]  ;;  %s2908_s28 = sshrl.u32 (!%p359_p13), %s484_s12, 3 }
  0x5c   : > { %p1849_p11 = scmp.le.s32.totalorder (!%p359_p13), %s2908_s28, 0 }
  0x5e   : > { %1714 = sbr.rel (%p1849_p11) target bundleno = 114 (0x72), region = 305  ;;  %s3618_s9 = smov (!%p1849_p11), %s2787_s22 }
  0x5f   : > { %s3619_s10 = smov (!%p1849_p11), %s2783_s18  ;;  %s2917_s25 = smov (!%p1849_p11), 0  }
  0x60   : > { %s2919_s0 = smov (!%p1849_p11), 0  }
  0x63 LB: >> { %v501_v18 = vld [vmem:[%s2567_s10 + $0x18] sm:$0xff]  ;;  %v517_v19 = vld [vmem:[%s2567_s10 + $0x30] sm:$0xff]  ;;  %v495_v20 = vld [vmem:[%s2567_s10] sm:$0xff]  ;;  %s559_s27 = sadd.s32 1, %s2571_s25  ;;  %s489_s0 = sadd.s32 1, %s2575_s0   ;;  %s2575_s0 = sphi %s2919_s0, %s489_s0   ;;  %s2571_s25 = sphi %s2917_s25, %s3622_s25   ;;  %s2567_s10 = sphi %s3619_s10, %s3621_s10   ;;  %s2563_s9 = sphi %s3618_s9, %s3620_s9  }
  0x64   : >> { %512 = vst [vmem:[%s2563_s9 + $0x10] sm:$0xff] %v501_v18  ;;  %v497_v21 = vld [vmem:[%s2567_s10 + $0x8] sm:$0xff]  ;;  %v513_v22 = vld [vmem:[%s2567_s10 + $0x20] sm:$0xff]  ;;  %v529_v23 = vld [vmem:[%s2567_s10 + $0x38] sm:$0xff]  ;;  %p560_p12 = scmp.ge.s32.totalorder %s559_s27, %s2908_s28  ;;  %p488_p13 = scmp.ge.s32.totalorder %s489_s0, %s2908_s28 }
  0x65   : >> { %528 = vst [vmem:[%s2563_s9 + $0x20] sm:$0xff] %v517_v19  ;;  %v523_v24 = vld [vmem:[%s2567_s10 + $0x48] sm:$0xff]  ;;  %v525_v25 = vld [vmem:[%s2567_s10 + $0x50] sm:$0xff]  ;;  %v537_v26 = vld [vmem:[%s2567_s10 + $0x58] sm:$0xff] }
  0x66   : >> { %496 = vst [vmem:[%s2563_s9] sm:$0xff] %v495_v20  ;;  %s3659_s27 = smov (%p560_p12, %s559_s27), 0  ;;  %v539_v27 = vld [vmem:[%s2567_s10 + $0x60] sm:$0xff]  ;;  %v541_v28 = vld [vmem:[%s2567_s10 + $0x68] sm:$0xff]  ;;  %v553_v29 = vld [vmem:[%s2567_s10 + $0x70] sm:$0xff] }
  0x67   : >> { %498 = vst [vmem:[%s2563_s9 + $0x8] sm:$0xff] %v497_v21  ;;  %s1850_s30 = sshll.u32 %s3659_s27, 6  ;;  %v555_v30 = vld [vmem:[%s2567_s10 + $0x78] sm:$0xff]  ;;  %v557_v31 = vld [vmem:[%s2567_s10 + $0x80] sm:$0xff]  ;;  %s3622_s25 = smov %s3659_s27 }
  0x68   : >> { %514 = vst [vmem:[%s2563_s9 + $0x18] sm:$0xff] %v513_v22  ;;  %s564_s13 = scalar_lea.vmem %s2783_s18, %s1850_s30   ;;  %s565_s19 = scalar_lea.vmem %s2787_s22, %s1850_s30 [#allocation2]  }
  0x69   : >> { %530 = vst [vmem:[%s2563_s9 + $0x28] sm:$0xff] %v529_v23  ;;  %s3621_s10 = smov %s564_s13 }
  0x6a   : >> { %544 = vst [vmem:[%s2563_s9 + $0x30] sm:$0xff] %v523_v24 }
  0x6b   : >> { %546 = vst [vmem:[%s2563_s9 + $0x38] sm:$0xff] %v525_v25 }
  0x6c   : >> { %548 = vst [vmem:[%s2563_s9 + $0x40] sm:$0xff] %v537_v26 }
  0x6d   : >> { %550 = vst [vmem:[%s2563_s9 + $0x48] sm:$0xff] %v539_v27  ;;  %491 = sbr.rel (!%p488_p13) target bundleno = 99 (0x63), region = 311 }
  0x6e   : >> { %552 = vst [vmem:[%s2563_s9 + $0x50] sm:$0xff] %v541_v28 }
  0x6f   : >> { %554 = vst [vmem:[%s2563_s9 + $0x58] sm:$0xff] %v553_v29 }
  0x70   : >> { %556 = vst [vmem:[%s2563_s9 + $0x60] sm:$0xff] %v555_v30 }
  0x71   : >> { %558 = vst [vmem:[%s2563_s9 + $0x68] sm:$0xff] %v557_v31  ;;  %s3620_s9 = smov %s565_s19 }
  0x72 PF: > { %s2974_s29 = sand.u32 7, %s484_s12   ;;  %s1953_s30 = sshll.u32 %s2908_s28, 6 }
  0x73   : > { %s2978_s17 = scalar_lea.vmem %s2783_s18, %s1953_s30   ;;  %s2981_s24 = scalar_lea.vmem %s2787_s22, %s1953_s30 [#allocation2]  }
  0x74   : > { %p1855_p0 = scmp.le.s32.totalorder %s2974_s29, 0 }
  0x75   : > { %s3623_s0 = smov (!%p1855_p0), %s2981_s24  ;;  %s3624_s9 = smov (!%p1855_p0), %s2978_s17 }
  0x76   : > { %1728 = sbr.rel (%p1855_p0) target bundleno = 131 (0x83), region = 316  ;;  %s2585_s10 = smov (!%p1855_p0), 0  }
  0x77   : > { %s2589_s25 = smov (!%p1855_p0), 0  }
  0x7b LB: >> { %v582_v32 = vld [vmem:[%s2583_s9] sm:$0xff]  ;;  %v584_v33 = vld [vmem:[%s2583_s9 + $0x18] sm:$0xff]  ;;  %v586_v34 = vld [vmem:[%s2583_s9 + $0x30] sm:$0xff]  ;;  %s590_s12 = sadd.s32 1, %s2587_s10  ;;  %s576_s25 = sadd.s32 1, %s2591_s25   ;;  %s2591_s25 = sphi %s2589_s25, %s576_s25   ;;  %s2587_s10 = sphi %s2585_s10, %s2586_s10   ;;  %s2583_s9 = sphi %s3624_s9, %s595_s9   ;;  %s2579_s0 = sphi %s3623_s0, %s596_s0  }
  0x7c   : >> { %583 = vst [vmem:[%s2579_s0] sm:$0xff] %v582_v32  ;;  %v588_v35 = vld [vmem:[%s2583_s9 + $0x48] sm:$0xff]  ;;  %p591_p1 = scmp.ge.s32.totalorder %s590_s12, %s2974_s29  ;;  %p575_p2 = scmp.ge.s32.totalorder %s576_s25, %s2974_s29 }
  0x7d   : >> { %585 = vst [vmem:[%s2579_s0 + $0x10] sm:$0xff] %v584_v33 }
  0x7e   : >> { %587 = vst [vmem:[%s2579_s0 + $0x20] sm:$0xff] %v586_v34  ;;  %s3661_s12 = smov (%p591_p1, %s590_s12), 0  ;;  %578 = sbr.rel (!%p575_p2) target bundleno = 123 (0x7b), region = 322 }
  0x7f   : >> { %589 = vst [vmem:[%s2579_s0 + $0x30] sm:$0xff] %v588_v35  ;;  %s1856_s28 = sshll.u32 %s3661_s12, 3  ;;  %s2586_s10 = smov %s3661_s12  }
  0x80   : >> { %s595_s9 = scalar_lea.vmem %s2978_s17, %s1856_s28   ;;  %s596_s0 = scalar_lea.vmem %s2981_s24, %s1856_s28 [#allocation2]  }
  0x83 PF: > { %s2657_s27 = smov 1  }
  0x84   : > { %s597_s13 = sshll.u32 %s2657_s27, %s2791_s26 }
  0x85   : > { %s1858_s19 = sadd.s32 4294967295, %s597_s13 }
  0x86   : > { %v607_v36 = vld [vmem:[%s2901_s20] sm:%s1858_s19]  ;;  %v609_v37 = vld [vmem:[%s2901_s20 + $0x18] sm:%s1858_s19] }
  0x87   : > { %608 = vst [vmem:[%s2904_s11] sm:%s1858_s19] %v607_v36  ;;  %v611_v38 = vld [vmem:[%s2901_s20 + $0x30] sm:%s1858_s19] }
  0x88   : > { %610 = vst [vmem:[%s2904_s11 + $0x10] sm:%s1858_s19] %v609_v37  ;;  %v613_v39 = vld [vmem:[%s2901_s20 + $0x48] sm:%s1858_s19] }
  0x89   : > { %612 = vst [vmem:[%s2904_s11 + $0x20] sm:%s1858_s19] %v611_v38 }
  0x8a   : > { %614 = vst [vmem:[%s2904_s11 + $0x30] sm:%s1858_s19] %v613_v39 }
  0x8b PF: > { %p1859_p3 = scmp.ge.u32.totalorder %s2785_s21, 8 }
  0x8c   : > { %s2658_s17 = smov (!%p1859_p3), 1  }
  0x8d   : > { %339 = sbr.rel (%p1859_p3) target bundleno = 151 (0x97), region = 60  ;;  %s340_s24 = sshll.u32 (!%p1859_p3), %s2658_s17, %s2785_s21 }
  0x8e   : > { %s1860_s26 = sadd.s32 (!%p1859_p3), 4294967295, %s340_s24 }
  0x92   : > { %v350_v40 = vld [vmem:[%s2783_s18] sm:%s1860_s26]  ;;  %v352_v41 = vld [vmem:[%s2783_s18 + $0x18] sm:%s1860_s26] }
  0x93   : > { %351 = vst [vmem:[%s2787_s22] sm:%s1860_s26] %v350_v40  ;;  %v354_v42 = vld [vmem:[%s2783_s18 + $0x30] sm:%s1860_s26] }
  0x94   : > { %353 = vst [vmem:[%s2787_s22 + $0x10] sm:%s1860_s26] %v352_v41  ;;  %v356_v43 = vld [vmem:[%s2783_s18 + $0x48] sm:%s1860_s26] }
  0x95   : > { %355 = vst [vmem:[%s2787_s22 + $0x20] sm:%s1860_s26] %v354_v42 }
  0x96   : > { %357 = vst [vmem:[%s2787_s22 + $0x30] sm:%s1860_s26] %v356_v43 }
  0x97 PF: > { %618 = sbr.rel (!%p2760_p5) target bundleno = 278 (0x116), region = 114  ;;  %s620_s20 = sand.u32 (%p2760_p5), 1, %s2523_s15  }
  0x98   : > { %s1862_s21 = sshll.u32 (%p2760_p5), %s2527_s16, 1  ;;  %s1861_s11 = sshll.u32 (%p2760_p5), %s620_s20, 5 }
  0x99   : > { %s624_s29 = ssub.s32 (%p2760_p5), 3, %s1862_s21  ;;  %s1955_s30 = sshll.u32 (%p2760_p5), %s2527_s16, 4 }
  0x9a   : > { %p625_p4 = scmp.lt.s32.totalorder (%p2760_p5), %s624_s29, 2  ;;  %s3027_s22 = scalar_lea.vmem (%p2760_p5), %s3575_s1, %s1955_s30  }
  0x9b   : > { %s3031_s23 = scalar_lea.vmem (%p2760_p5), [#allocation3], %s1861_s11  }
  0x9c   : > { %s3663_s29 = smov (!%p625_p4, %s624_s29), 2 }
  0x9d   : > { %s1863_s9 = sshll.u32 %s3663_s29, 4  ;;  %s3029_s10 = sshll.u32 %s3663_s29, 3 }
  0x9e   : > { %p1867_p5 = scmp.eq.s32.totalorder %s1863_s9, 0 }
  0x9f   : > { %p635_p7 = scmp.lt.u32.totalorder (!%p1867_p5), %s3029_s10, 8 }
  0xa0   : > { %634 = sbr.rel (%p1867_p5) target bundleno = 278 (0x116), region = 118 }
  0xa5   : > { %638 = sbr.rel (%p635_p7) target bundleno = 268 (0x10c), region = 122  ;;  %s3035_s25 = sand.u32 (!%p635_p7), 7, %s3029_s10  }
  0xa6   : > { %p657_p10 = scmp.eq.s32.totalorder (!%p635_p7), %s3035_s25, 0  ;;  %p1868_p11 = scmp.ne.s32.totalorder (!%p635_p7), %s3035_s25, 0 }
  0xaa   : > { %660 = sbr.rel (%p1868_p11) target bundleno = 216 (0xd8), region = 137  ;;  %s661_s12 = sshrl.u32 (!%p1868_p11), %s3029_s10, 3 }
  0xab   : > { %s3042_s28 = sshrl.u32 (!%p1868_p11), %s661_s12, 4 }
  0xac   : > { %p1869_p12 = scmp.le.s32.totalorder (!%p1868_p11), %s3042_s28, 0 }
  0xaf   : > { %1742 = sbr.rel (%p1869_p12) target bundleno = 199 (0xc7), region = 327  ;;  %s3625_s27 = smov (!%p1869_p12), %s3031_s23 }
  0xb0   : > { %s3626_s13 = smov (!%p1869_p12), %s3027_s22  ;;  %s3051_s19 = smov (!%p1869_p12), 0  }
  0xb1   : > { %s3053_s17 = smov (!%p1869_p12), 0  }
  0xb4 LB: >> { %v678_v44 = vld [vmem:[%s2599_s13 + $0x18] sm:$0xff]  ;;  %v680_v45 = vld [vmem:[%s2599_s13 + $0x20] sm:$0xff]  ;;  %v682_v46 = vld [vmem:[%s2599_s13 + $0x28] sm:$0xff]  ;;  %s736_s24 = sadd.s32 1, %s2603_s19  ;;  %s666_s17 = sadd.s32 1, %s2607_s17   ;;  %s2607_s17 = sphi %s3053_s17, %s666_s17   ;;  %s2603_s19 = sphi %s3051_s19, %s3629_s19   ;;  %s2599_s13 = sphi %s3626_s13, %s3628_s13   ;;  %s2595_s27 = sphi %s3625_s27, %s3627_s27  }
  0xb5   : >> { %v684_v47 = vld [vmem:[%s2599_s13 + $0x30] sm:$0xff]  ;;  %705 = vst [vmem:[%s2595_s27 + $0x10] sm:$0xff] %v678_v44  ;;  %p737_p13 = scmp.ge.s32.totalorder %s736_s24, %s3042_s28  ;;  %v686_v48 = vld [vmem:[%s2599_s13 + $0x38] sm:$0xff]  ;;  %v672_v49 = vld [vmem:[%s2599_s13] sm:$0xff]  ;;  %p665_p0 = scmp.ge.s32.totalorder %s666_s17, %s3042_s28 }
  0xb6   : >> { %707 = vst [vmem:[%s2595_s27 + $0x18] sm:$0xff] %v680_v45  ;;  %v674_v50 = vld [vmem:[%s2599_s13 + $0x8] sm:$0xff]  ;;  %v688_v51 = vld [vmem:[%s2599_s13 + $0x40] sm:$0xff]  ;;  %v692_v53 = vld [vmem:[%s2599_s13 + $0x50] sm:$0xff] }
  0xb7   : >> { %709 = vst [vmem:[%s2595_s27 + $0x20] sm:$0xff] %v682_v46  ;;  %s3665_s24 = smov (%p737_p13, %s736_s24), 0  ;;  %v690_v52 = vld [vmem:[%s2599_s13 + $0x48] sm:$0xff]  ;;  %v694_v54 = vld [vmem:[%s2599_s13 + $0x58] sm:$0xff]  ;;  %v696_v55 = vld [vmem:[%s2599_s13 + $0x60] sm:$0xff] }
  0xb8   : >> { %711 = vst [vmem:[%s2595_s27 + $0x28] sm:$0xff] %v684_v47  ;;  %s1870_s26 = sshll.u32 %s3665_s24, 7  ;;  %v698_v56 = vld [vmem:[%s2599_s13 + $0x68] sm:$0xff]  ;;  %v700_v57 = vld [vmem:[%s2599_s13 + $0x70] sm:$0xff]  ;;  %v702_v58 = vld [vmem:[%s2599_s13 + $0x78] sm:$0xff]  ;;  %s3629_s19 = smov %s3665_s24 }
  0xb9   : >> { %673 = vst [vmem:[%s2595_s27] sm:$0xff] %v672_v49  ;;  %s741_s20 = scalar_lea.vmem %s3027_s22, %s1870_s26   ;;  %s742_s21 = scalar_lea.vmem %s3031_s23, %s1870_s26 [#allocation3]   ;;  %v730_v59 = vld [vmem:[%s2599_s13 + $0x80] sm:$0xff]  ;;  %v732_v60 = vld [vmem:[%s2599_s13 + $0x88] sm:$0xff]  ;;  %v734_v61 = vld [vmem:[%s2599_s13 + $0x90] sm:$0xff] }
  0xba   : >> { %675 = vst [vmem:[%s2595_s27 + $0x8] sm:$0xff] %v674_v50  ;;  %s3628_s13 = smov %s741_s20 }
  0xbb   : >> { %713 = vst [vmem:[%s2595_s27 + $0x30] sm:$0xff] %v686_v48 }
  0xbc   : >> { %715 = vst [vmem:[%s2595_s27 + $0x38] sm:$0xff] %v688_v51 }
  0xbd   : >> { %717 = vst [vmem:[%s2595_s27 + $0x40] sm:$0xff] %v690_v52 }
  0xbe   : >> { %719 = vst [vmem:[%s2595_s27 + $0x48] sm:$0xff] %v692_v53 }
  0xbf   : >> { %721 = vst [vmem:[%s2595_s27 + $0x50] sm:$0xff] %v694_v54 }
  0xc0   : >> { %723 = vst [vmem:[%s2595_s27 + $0x58] sm:$0xff] %v696_v55 }
  0xc1   : >> { %725 = vst [vmem:[%s2595_s27 + $0x60] sm:$0xff] %v698_v56 }
  0xc2   : >> { %727 = vst [vmem:[%s2595_s27 + $0x68] sm:$0xff] %v700_v57  ;;  %668 = sbr.rel (!%p665_p0) target bundleno = 180 (0xb4), region = 333 }
  0xc3   : >> { %729 = vst [vmem:[%s2595_s27 + $0x70] sm:$0xff] %v702_v58 }
  0xc4   : >> { %731 = vst [vmem:[%s2595_s27 + $0x78] sm:$0xff] %v730_v59 }
  0xc5   : >> { %733 = vst [vmem:[%s2595_s27 + $0x80] sm:$0xff] %v732_v60 }
  0xc6   : >> { %735 = vst [vmem:[%s2595_s27 + $0x88] sm:$0xff] %v734_v61  ;;  %s3627_s27 = smov %s742_s21 }
  0xc7 PF: > { %s3120_s11 = sand.u32 15, %s661_s12   ;;  %s1956_s29 = sshll.u32 %s3042_s28, 7 }
  0xc8   : > { %s3124_s30 = scalar_lea.vmem %s3027_s22, %s1956_s29   ;;  %s749_s0 = scalar_lea.vmem %s3031_s23, %s1956_s29 [#allocation3]  }
  0xc9   : > { %p1875_p1 = scmp.le.s32.totalorder %s3120_s11, 0 }
  0xca   : > { %s2609_s18 = smov (!%p1875_p1), %s749_s0   ;;  %s2613_s9 = smov (!%p1875_p1), %s3124_s30  }
  0xcb   : > { %1756 = sbr.rel (%p1875_p1) target bundleno = 216 (0xd8), region = 338  ;;  %s2617_s17 = smov (!%p1875_p1), 0  }
  0xcc   : > { %s2621_s24 = smov (!%p1875_p1), 0  }
  0xd0 LB: >> { %v759_v62 = vld [vmem:[%s2615_s9] sm:$0xff]  ;;  %v761_v63 = vld [vmem:[%s2615_s9 + $0x18] sm:$0xff]  ;;  %s763_s12 = sadd.s32 1, %s2619_s17  ;;  %s753_s24 = sadd.s32 1, %s2623_s24   ;;  %s2623_s24 = sphi %s2621_s24, %s753_s24   ;;  %s2619_s17 = sphi %s2617_s17, %s2618_s17   ;;  %s2615_s9 = sphi %s2613_s9, %s768_s9   ;;  %s2611_s18 = sphi %s2609_s18, %s769_s18  }
  0xd1   : >> { %760 = vst [vmem:[%s2611_s18] sm:$0xff] %v759_v62  ;;  %p764_p2 = scmp.ge.s32.totalorder %s763_s12, %s3120_s11  ;;  %p752_p3 = scmp.ge.s32.totalorder %s753_s24, %s3120_s11 }
  0xd2   : >> { %762 = vst [vmem:[%s2611_s18 + $0x10] sm:$0xff] %v761_v63 }
  0xd3   : >> { %s3667_s12 = smov (%p764_p2, %s763_s12), 0  ;;  %755 = sbr.rel (!%p752_p3) target bundleno = 208 (0xd0), region = 344 }
  0xd4   : >> { %s1876_s28 = sshll.u32 %s3667_s12, 3  ;;  %s2618_s17 = smov %s3667_s12  }
  0xd5   : >> { %s768_s9 = scalar_lea.vmem %s3124_s30, %s1876_s28   ;;  %s769_s18 = scalar_lea.vmem %s749_s0, %s1876_s28 [#allocation3]  }
  0xd8 PF: > { %772 = sbr.rel (%p657_p10) target bundleno = 268 (0x10c), region = 155  ;;  %s774_s27 = ssub.s32 (!%p657_p10), %s3029_s10, %s3035_s25 }
  0xd9   : > { %s778_s13 = sshrl.u32 (!%p657_p10), %s3029_s10, 3  ;;  %s3138_s19 = scalar_lea.vmem (!%p657_p10), %s3027_s22, %s774_s27 }
  0xda   : > { %s3141_s26 = scalar_lea.vmem (!%p657_p10), %s3031_s23, %s774_s27 [#allocation3]  ;;  %s3145_s20 = sshrl.u32 (!%p657_p10), %s778_s13, 4 }
  0xdb   : > { %p1878_p4 = scmp.le.s32.totalorder (!%p657_p10), %s3145_s20, 0 }
  0xdd   : > { %1770 = sbr.rel (%p1878_p4) target bundleno = 245 (0xf5), region = 349  ;;  %s3630_s21 = smov (!%p1878_p4), %s3031_s23 }
  0xde   : > { %s3631_s11 = smov (!%p1878_p4), %s3027_s22  ;;  %s3154_s29 = smov (!%p1878_p4), 0  }
  0xdf   : > { %s3156_s30 = smov (!%p1878_p4), 0  }
  0xe2 LB: >> { %v795_v0 = vld [vmem:[%s2631_s11 + $0x18] sm:$0xff]  ;;  %v797_v1 = vld [vmem:[%s2631_s11 + $0x20] sm:$0xff]  ;;  %v799_v2 = vld [vmem:[%s2631_s11 + $0x28] sm:$0xff]  ;;  %s853_s0 = sadd.s32 1, %s2635_s29  ;;  %s783_s30 = sadd.s32 1, %s2639_s30   ;;  %s2639_s30 = sphi %s3156_s30, %s783_s30   ;;  %s2635_s29 = sphi %s3154_s29, %s3634_s29   ;;  %s2631_s11 = sphi %s3631_s11, %s3633_s11   ;;  %s2627_s21 = sphi %s3630_s21, %s3632_s21  }
  0xe3   : >> { %v801_v3 = vld [vmem:[%s2631_s11 + $0x30] sm:$0xff]  ;;  %822 = vst [vmem:[%s2627_s21 + $0x10] sm:$0xff] %v795_v0  ;;  %p854_p5 = scmp.ge.s32.totalorder %s853_s0, %s3145_s20  ;;  %v803_v4 = vld [vmem:[%s2631_s11 + $0x38] sm:$0xff]  ;;  %v789_v5 = vld [vmem:[%s2631_s11] sm:$0xff]  ;;  %p782_p7 = scmp.ge.s32.totalorder %s783_s30, %s3145_s20 }
  0xe4   : >> { %824 = vst [vmem:[%s2627_s21 + $0x18] sm:$0xff] %v797_v1  ;;  %v791_v6 = vld [vmem:[%s2631_s11 + $0x8] sm:$0xff]  ;;  %v805_v7 = vld [vmem:[%s2631_s11 + $0x40] sm:$0xff]  ;;  %v809_v9 = vld [vmem:[%s2631_s11 + $0x50] sm:$0xff] }
  0xe5   : >> { %826 = vst [vmem:[%s2627_s21 + $0x20] sm:$0xff] %v799_v2  ;;  %s3669_s0 = smov (%p854_p5, %s853_s0), 0  ;;  %v807_v8 = vld [vmem:[%s2631_s11 + $0x48] sm:$0xff]  ;;  %v811_v10 = vld [vmem:[%s2631_s11 + $0x58] sm:$0xff]  ;;  %v813_v11 = vld [vmem:[%s2631_s11 + $0x60] sm:$0xff] }
  0xe6   : >> { %828 = vst [vmem:[%s2627_s21 + $0x28] sm:$0xff] %v801_v3  ;;  %s1879_s18 = sshll.u32 %s3669_s0, 7  ;;  %v815_v12 = vld [vmem:[%s2631_s11 + $0x68] sm:$0xff]  ;;  %v817_v13 = vld [vmem:[%s2631_s11 + $0x70] sm:$0xff]  ;;  %v819_v14 = vld [vmem:[%s2631_s11 + $0x78] sm:$0xff]  ;;  %s3634_s29 = smov %s3669_s0 }
  0xe7   : >> { %790 = vst [vmem:[%s2627_s21] sm:$0xff] %v789_v5  ;;  %s858_s9 = scalar_lea.vmem %s3027_s22, %s1879_s18   ;;  %s859_s17 = scalar_lea.vmem %s3031_s23, %s1879_s18 [#allocation3]   ;;  %v847_v15 = vld [vmem:[%s2631_s11 + $0x80] sm:$0xff]  ;;  %v849_v16 = vld [vmem:[%s2631_s11 + $0x88] sm:$0xff]  ;;  %v851_v17 = vld [vmem:[%s2631_s11 + $0x90] sm:$0xff] }
  0xe8   : >> { %792 = vst [vmem:[%s2627_s21 + $0x8] sm:$0xff] %v791_v6  ;;  %s3633_s11 = smov %s858_s9 }
  0xe9   : >> { %830 = vst [vmem:[%s2627_s21 + $0x30] sm:$0xff] %v803_v4 }
  0xea   : >> { %832 = vst [vmem:[%s2627_s21 + $0x38] sm:$0xff] %v805_v7 }
  0xeb   : >> { %834 = vst [vmem:[%s2627_s21 + $0x40] sm:$0xff] %v807_v8 }
  0xec   : >> { %836 = vst [vmem:[%s2627_s21 + $0x48] sm:$0xff] %v809_v9 }
  0xed   : >> { %838 = vst [vmem:[%s2627_s21 + $0x50] sm:$0xff] %v811_v10 }
  0xee   : >> { %840 = vst [vmem:[%s2627_s21 + $0x58] sm:$0xff] %v813_v11 }
  0xef   : >> { %842 = vst [vmem:[%s2627_s21 + $0x60] sm:$0xff] %v815_v12 }
  0xf0   : >> { %844 = vst [vmem:[%s2627_s21 + $0x68] sm:$0xff] %v817_v13  ;;  %785 = sbr.rel (!%p782_p7) target bundleno = 226 (0xe2), region = 355 }
  0xf1   : >> { %846 = vst [vmem:[%s2627_s21 + $0x70] sm:$0xff] %v819_v14 }
  0xf2   : >> { %848 = vst [vmem:[%s2627_s21 + $0x78] sm:$0xff] %v847_v15 }
  0xf3   : >> { %850 = vst [vmem:[%s2627_s21 + $0x80] sm:$0xff] %v849_v16 }
  0xf4   : >> { %852 = vst [vmem:[%s2627_s21 + $0x88] sm:$0xff] %v851_v17  ;;  %s3632_s21 = smov %s859_s17 }
  0xf5 PF: > { %s3223_s24 = sand.u32 15, %s778_s13   ;;  %s1958_s12 = sshll.u32 %s3145_s20, 7 }
  0xf6   : > { %s3227_s28 = scalar_lea.vmem %s3027_s22, %s1958_s12   ;;  %s866_s27 = scalar_lea.vmem %s3031_s23, %s1958_s12 [#allocation3]  }
  0xf7   : > { %p1884_p10 = scmp.le.s32.totalorder %s3223_s24, 0 }
  0xf8   : > { %s2641_s18 = smov (!%p1884_p10), %s866_s27   ;;  %s2645_s0 = smov (!%p1884_p10), %s3227_s28  }
  0xf9   : > { %1784 = sbr.rel (%p1884_p10) target bundleno = 262 (0x106), region = 360  ;;  %s2649_s30 = smov (!%p1884_p10), 0  }
  0xfa   : > { %s2653_s9 = smov (!%p1884_p10), 0  }
  0xfe LB: >> { %v876_v18 = vld [vmem:[%s2647_s0] sm:$0xff]  ;;  %v878_v19 = vld [vmem:[%s2647_s0 + $0x18] sm:$0xff]  ;;  %s880_s13 = sadd.s32 1, %s2651_s30  ;;  %s870_s9 = sadd.s32 1, %s2655_s9   ;;  %s2655_s9 = sphi %s2653_s9, %s870_s9   ;;  %s2651_s30 = sphi %s2649_s30, %s2650_s30   ;;  %s2647_s0 = sphi %s2645_s0, %s885_s0   ;;  %s2643_s18 = sphi %s2641_s18, %s886_s18  }
  0xff   : >> { %877 = vst [vmem:[%s2643_s18] sm:$0xff] %v876_v18  ;;  %p881_p11 = scmp.ge.s32.totalorder %s880_s13, %s3223_s24  ;;  %p869_p12 = scmp.ge.s32.totalorder %s870_s9, %s3223_s24 }
 0x100   : >> { %879 = vst [vmem:[%s2643_s18 + $0x10] sm:$0xff] %v878_v19 }
 0x101   : >> { %s3671_s13 = smov (%p881_p11, %s880_s13), 0  ;;  %872 = sbr.rel (!%p869_p12) target bundleno = 254 (0xfe), region = 366 }
 0x102   : >> { %s1885_s20 = sshll.u32 %s3671_s13, 3  ;;  %s2650_s30 = smov %s3671_s13  }
 0x103   : >> { %s885_s0 = scalar_lea.vmem %s3227_s28, %s1885_s20   ;;  %s886_s18 = scalar_lea.vmem %s866_s27, %s1885_s20 [#allocation3]  }
 0x106 PF: > { %s2659_s21 = smov 1  }
 0x107   : > { %s887_s11 = sshll.u32 %s2659_s21, %s3035_s25 }
 0x108   : > { %s1887_s29 = sadd.s32 4294967295, %s887_s11 }
 0x109   : > { %v897_v20 = vld [vmem:[%s3138_s19] sm:%s1887_s29]  ;;  %v899_v21 = vld [vmem:[%s3138_s19 + $0x18] sm:%s1887_s29] }
 0x10a   : > { %898 = vst [vmem:[%s3141_s26] sm:%s1887_s29] %v897_v20 }
 0x10b   : > { %900 = vst [vmem:[%s3141_s26 + $0x10] sm:%s1887_s29] %v899_v21 }
 0x10c PF: > { %p1888_p13 = scmp.ge.u32.totalorder %s3029_s10, 8 }
 0x10d   : > { %s2660_s17 = smov (!%p1888_p13), 1  }
 0x10e   : > { %641 = sbr.rel (%p1888_p13) target bundleno = 278 (0x116), region = 126  ;;  %s642_s24 = sshll.u32 (!%p1888_p13), %s2660_s17, %s3029_s10 }
 0x10f   : > { %s1889_s12 = sadd.s32 (!%p1888_p13), 4294967295, %s642_s24 }
 0x113   : > { %v652_v22 = vld [vmem:[%s3027_s22] sm:%s1889_s12]  ;;  %v654_v23 = vld [vmem:[%s3027_s22 + $0x18] sm:%s1889_s12] }
 0x114   : > { %653 = vst [vmem:[%s3031_s23] sm:%s1889_s12] %v652_v22 }
 0x115   : > { %655 = vst [vmem:[%s3031_s23 + $0x10] sm:%s1889_s12] %v654_v23 }
 0x116 PF: > { %p1890_p0 = scmp.ge.s32.totalorder %s2527_s16, 1  ;;  %p903_p1 = scmp.lt.s32.totalorder %s2527_s16, 3 }
 0x118   : > { %p904_p2 = pnand %p1890_p0, %p903_p1 }
 0x119   : > { %s3252_s10 = sand.u32 (!%p904_p2), 1, %s2519_s14  }
 0x11a   : > { %907 = sbr.rel (%p904_p2) target bundleno = 876 (0x36c), region = 180  ;;  %s1892_s20 = sshll.u32 (!%p904_p2), %s3252_s10, 5 }
 0x11b   : > { %s919_s21 = scalar_lea.vmem (!%p904_p2), [#allocation3], %s1892_s20  ;;  %s1891_s11 = sshll.u32 (!%p904_p2), %s3252_s10, 6 }
 0x11c   : > { %s912_s24 = scalar_lea.vmem (!%p904_p2), [#allocation2], %s1891_s11  ;;  %s3457_s18 = scalar_lea.vmem (!%p904_p2), [#allocation4], %s1892_s20 }
 0x11d   : > { %s1894_s20 = sshll.u32 (!%p904_p2), %s3252_s10, 1  ;;  %s1491_s30 = scalar_lea.sflag (!%p904_p2), [#allocation5], %s3252_s10 }
 0x11e   : > { %s3468_s0 = scalar_lea.vmem (!%p904_p2), [#allocation6], %s1894_s20 }
 0x11f   : > { %v995_v24 = vld [vmem:[%s3576_s2 + $0x8] sm:$0xff]  ;;  %v2661_v25 = vmov 0   ;;  %v994_v26 = vld [vmem:[%s3576_s2] sm:$0xff]  ;;  %v1245_v27 = vld [vmem:[%s3580_s6 + $0x18] sm:$0xff]  ;;  %vm1028_vm0 = vcmask 130048   ;;  %vm1135_vm1 = vcmask 261120  }
 0x120   : > { %2272 = vset.pattern.permute.xlu0 %v2661_v25  ;;  %2273 = vset.pattern.permute.xlu1 %v2661_v25  ;;  %v1242_v28 = vld [vmem:[%s3580_s6] sm:$0xff]  ;;  %v1329_v29 = vld [vmem:[%s3582_s8 + $0x10] sm:$0xff]  ;;  %v3274_v32 = vld [vmem:[%s919_s21 + $0x18] sm:$0xff]  ;;  %vm1357_vm2 = vcmask 523264   ;;  %vm1482_vm3 = vcmask 1040384  }
 0x121   : > { %1005 = vperm.xlu0 %2272, %v995_v24   ;;  %2274 = vset.pattern.permute.xlu2 %v2661_v25  ;;  %v996_v30 = vld [vmem:[%s3577_s3] sm:$0xff]  ;;  %v3272_v31 = vld [vmem:[%s919_s21 + $0x10] sm:$0xff]  ;;  %v3289_v37 = vld [vmem:[%s919_s21 + $0x8] sm:$0xff] }
 0x122   : > { %v3287_v36 = vld [vmem:[%s919_s21] sm:$0xff]  ;;  %v1026_v41 = vld [vmem:[%s3579_s5 + $0x30] sm:$0xff]  ;;  %v989_v43 = vld [vmem:[%s912_s24 + $0x38] sm:$0xff]  ;;  %s3636_s21 = sld [smem:[#allocation11_spill]] (%p2764_p6) }
 0x123   : > { %v988_v42 = vld [vmem:[%s912_s24 + $0x30] sm:$0xff]  ;;  %v1020_v44 = vld [vmem:[%s3579_s5] sm:$0xff]  ;;  %v987_v46 = vld [vmem:[%s912_s24 + $0x28] sm:$0xff] }
 0x124   : > { %v986_v45 = vld [vmem:[%s912_s24 + $0x20] sm:$0xff]  ;;  %v1249_v47 = vld [vmem:[%s3580_s6 + $0x38] sm:$0xff]  ;;  %v984_v48 = vld [vmem:[%s912_s24 + $0x10] sm:$0xff] }
 0x125   : > { %v985_v49 = vld [vmem:[%s912_s24 + $0x18] sm:$0xff]  ;;  %v982_v50 = vld [vmem:[%s912_s24] sm:$0xff]  ;;  %v983_v51 = vld [vmem:[%s912_s24 + $0x8] sm:$0xff]  ;;  %1287 = vperm.xlu1 %2273, %v1249_v47  }
 0x126   : > { %v1027_v52 = vld [vmem:[%s3579_s5 + $0x38] sm:$0xff]  ;;  %v1021_v53 = vld [vmem:[%s3579_s5 + $0x8] sm:$0xff]  ;;  %v1248_v54 = vld [vmem:[%s3580_s6 + $0x30] sm:$0xff] }
 0x127   : > { %v1012_v55 = vld [vmem:[%s3578_s4] sm:$0xff]  ;;  %v1022_v56 = vld [vmem:[%s3579_s5 + $0x10] sm:$0xff]  ;;  %v1247_v57 = vld [vmem:[%s3580_s6 + $0x28] sm:$0xff] }
 0x128   : > { %1277 = vperm.xlu2 %2274, %v1247_v57   ;;  %v1244_v58 = vld [vmem:[%s3580_s6 + $0x10] sm:$0xff]  ;;  %v1013_v59 = vld [vmem:[%s3578_s4 + $0x8] sm:$0xff]  ;;  %v1023_v60 = vld [vmem:[%s3579_s5 + $0x18] sm:$0xff]  ;;  %s1939_s11 = sshll.u32 (%p2764_p6), %s3636_s21, 1 }
 0x129   : > { %1000 = vperm.xlu0 %2272, %v994_v26   ;;  %v1246_v61 = vld [vmem:[%s3580_s6 + $0x20] sm:$0xff]  ;;  %v1014_v62 = vld [vmem:[%s3578_s4 + $0x10] sm:$0xff]  ;;  %v1243_v0 = vld [vmem:[%s3580_s6 + $0x8] sm:$0xff]  ;;  %s1504_s29 = ssub.s32 (%p2764_p6), 3, %s1939_s11 }
 0x12a   : > { %v1024_v63 = vld [vmem:[%s3579_s5 + $0x20] sm:$0xff]  ;;  %v1015_v2 = vld [vmem:[%s3578_s4 + $0x18] sm:$0xff]  ;;  %v1025_v3 = vld [vmem:[%s3579_s5 + $0x28] sm:$0xff]  ;;  %p1505_p3 = scmp.lt.s32.totalorder (%p2764_p6), %s1504_s29, 2 }
 0x12b   : > { %v1327_v1 = vld [vmem:[%s3582_s8] sm:$0xff]  ;;  %v1328_v4 = vld [vmem:[%s3582_s8 + $0x8] sm:$0xff]  ;;  %v1330_v5 = vld [vmem:[%s3582_s8 + $0x18] sm:$0xff] }
 0x12c   : > { %v1016_v6 = vld [vmem:[%s3578_s4 + $0x20] sm:$0xff]  ;;  %v997_v8 = vld [vmem:[%s3577_s3 + $0x8] sm:$0xff]  ;;  %v1018_v10 = vld [vmem:[%s3578_s4 + $0x30] sm:$0xff] }
 0x12d   : > { %1282 = vperm.xlu1 %2273, %v1248_v54   ;;  %v1331_v7 = vld [vmem:[%s3582_s8 + $0x20] sm:$0xff]  ;;  %v1017_v9 = vld [vmem:[%s3578_s4 + $0x28] sm:$0xff]  ;;  %v1019_v11 = vld [vmem:[%s3578_s4 + $0x38] sm:$0xff] }
 0x130   : > { %1272 = vperm.xlu2 %2274, %v1246_v61  }
 0x131   : > { %1267 = vperm.xlu0 %2272, %v1245_v27  }
 0x135   : > { %1262 = vperm.xlu1 %2273, %v1244_v58  }
 0x138   : > { %1257 = vperm.xlu2 %2274, %v1243_v0  }
 0x139   : > { %1252 = vperm.xlu0 %2272, %v1242_v28  }
 0x13d   : > { %1334 = vperm.xlu1 %2273, %v1327_v1  }
 0x140   : > { %1339 = vperm.xlu2 %2274, %v1328_v4  }
 0x141   : > { %1344 = vperm.xlu0 %2272, %v1329_v29  }
 0x145   : > { %1349 = vperm.xlu1 %2273, %v1330_v5  }
 0x148   : > { %1354 = vperm.xlu2 %2274, %v1331_v7  }
 0x149   : > { %1459 = vperm.xlu0 %2272, %v996_v30  }
 0x14d   : > { %1464 = vperm.xlu1 %2273, %v997_v8  }
 0x182   : > { %v1278_v47 = vpop.permute.xlu2 %1277 }
 0x193   : > { %v1006_v33 = vpop.permute.xlu0 %1005 }
 0x194   : > { %v3277_v34 = vmul.f32 %v1006_v33, %v3272_v31  ;;  %v3280_v35 = vmul.f32 %v1006_v33, %v3274_v32 }
 0x196   : > { %1067 = vmatpush.msra.mxu0 %v3277_v34  ;;  %1963 = vmatpush.msra.mxu2 %v3277_v34 }
 0x197   : > { %1108 = vmatpush.msra.mxu1 %v3280_v35  ;;  %1965 = vmatpush.msra.mxu3 %v3280_v35 }
 0x19b   : > { %v1001_v38 = vpop.permute.xlu0 %1000 }
 0x19c   : > { %v3292_v39 = vmul.f32 %v1001_v38, %v3287_v36  ;;  %v3295_v40 = vmul.f32 %v1001_v38, %v3289_v37 }
 0x19e   : > { %1068 = vmatpush.msra.mxu0 %v3292_v39  ;;  %1964 = vmatpush.msra.mxu2 %v3292_v39 }
 0x19f   : > { %1109 = vmatpush.msra.mxu1 %v3295_v40  ;;  %1966 = vmatpush.msra.mxu3 %v3295_v40 }
 0x1a0   : > { %1901 = vmatmul.msk.f32.vlgmr.msra.gmra.mxu2 %vm1028_vm0, %v1026_v41  ;;  %1909 = vmatmul.msk.f32.vlgmr.msra.gmra.mxu3 %vm1028_vm0, %v1026_v41 }
 0x1a1   : > { %1172 = vmatpush.msrb.mxu2 %v988_v42  ;;  %1213 = vmatpush.msrb.mxu3 %v989_v43 }
 0x1a2   : > { %1895 = vmatmul.msk.f32.vlgmr.msra.gmra.mxu0 %vm1028_vm0, %v1020_v44  ;;  %1903 = vmatmul.msk.f32.vlgmr.msra.gmra.mxu1 %vm1028_vm0, %v1020_v44  ;;  %v1288_v44 = vpop.permute.xlu1 %1287 }
 0x1a3   : > { %1173 = vmatpush.msrb.mxu2 %v986_v45  ;;  %1214 = vmatpush.msrb.mxu3 %v987_v46  ;;  %v1268_v4 = vpop.permute.xlu0 %1267 }
 0x1a5   : > { %1174 = vmatpush.msrb.mxu2 %v984_v48  ;;  %1215 = vmatpush.msrb.mxu3 %v985_v49 }
 0x1a7   : > { %1175 = vmatpush.msrb.mxu2 %v982_v50  ;;  %1216 = vmatpush.msrb.mxu3 %v983_v51 }
 0x1a8   : > { %1902 = vmatmul.msk.f32.gmra.mxu2 %vm1028_vm0, %v1027_v52  ;;  %1910 = vmatmul.msk.f32.gmra.mxu3 %vm1028_vm0, %v1027_v52 }
 0x1aa   : > { %1896 = vmatmul.msk.f32.gmra.mxu0 %vm1028_vm0, %v1021_v53  ;;  %1904 = vmatmul.msk.f32.gmra.mxu1 %vm1028_vm0, %v1021_v53  ;;  %v1283_v50 = vpop.permute.xlu1 %1282  ;;  %v1273_v53 = vpop.permute.xlu2 %1272 }
 0x1b0   : > { %1911 = vmatmul.msk.f32.vlgmr.msrb.gmra.mxu2 %vm1135_vm1, %v1012_v55  ;;  %1919 = vmatmul.msk.f32.vlgmr.msrb.gmra.mxu3 %vm1135_vm1, %v1012_v55 }
 0x1b2   : > { %1897 = vmatmul.msk.f32.gmra.mxu0 %vm1028_vm0, %v1022_v56  ;;  %1905 = vmatmul.msk.f32.gmra.mxu1 %vm1028_vm0, %v1022_v56 }
 0x1b8   : > { %1912 = vmatmul.msk.f32.gmra.mxu2 %vm1135_vm1, %v1013_v59  ;;  %1920 = vmatmul.msk.f32.gmra.mxu3 %vm1135_vm1, %v1013_v59 }
 0x1ba   : > { %1898 = vmatmul.msk.f32.gmra.mxu0 %vm1028_vm0, %v1023_v60  ;;  %1906 = vmatmul.msk.f32.gmra.mxu1 %vm1028_vm0, %v1023_v60 }
 0x1c0   : > { %1913 = vmatmul.msk.f32.gmra.mxu2 %vm1135_vm1, %v1014_v62  ;;  %1921 = vmatmul.msk.f32.gmra.mxu3 %vm1135_vm1, %v1014_v62 }
 0x1c2   : > { %1907 = vmatmul.msk.f32.gmra.mxu1 %vm1028_vm0, %v1024_v63  ;;  %1899 = vmatmul.msk.f32.gmra.mxu0 %vm1028_vm0, %v1024_v63 }
 0x1c8   : > { %1914 = vmatmul.msk.f32.gmra.mxu2 %vm1135_vm1, %v1015_v2  ;;  %1922 = vmatmul.msk.f32.gmra.mxu3 %vm1135_vm1, %v1015_v2 }
 0x1ca   : > { %1908 = vmatmul.msk.f32.gmra.mxu1 %vm1028_vm0, %v1025_v3  ;;  %1900 = vmatmul.msk.f32.gmra.mxu0 %vm1028_vm0, %v1025_v3 }
 0x1d0   : > { %1915 = vmatmul.msk.f32.gmra.mxu2 %vm1135_vm1, %v1016_v6  ;;  %1923 = vmatmul.msk.f32.gmra.mxu3 %vm1135_vm1, %v1016_v6 }
 0x1d8   : > { %1916 = vmatmul.msk.f32.gmra.mxu2 %vm1135_vm1, %v1017_v9  ;;  %1924 = vmatmul.msk.f32.gmra.mxu3 %vm1135_vm1, %v1017_v9 }
 0x1e0   : > { %1917 = vmatmul.msk.f32.gmra.mxu2 %vm1135_vm1, %v1018_v10  ;;  %1925 = vmatmul.msk.f32.gmra.mxu3 %vm1135_vm1, %v1018_v10 }
 0x1e8   : > { %1918 = vmatmul.msk.f32.gmra.mxu2 %vm1135_vm1, %v1019_v11  ;;  %1926 = vmatmul.msk.f32.gmra.mxu3 %vm1135_vm1, %v1019_v11 }
 0x21f   : > { %v3418_v18 = vpop.f32.mrf.mxu1  ;;  %v3420_v19 = vpop.f32.mrf.mxu0 }
 0x223   : > { %v1088_v12 = vpop.f32.mrf.mxu2  ;;  %v1129_v13 = vpop.f32.mrf.mxu3 }
 0x227   : > { %v1114_v22 = vpop.f32.mrf.mxu1  ;;  %v1073_v23 = vpop.f32.mrf.mxu0 }
 0x22b   : > { %v1091_v14 = vpop.f32.mrf.mxu2  ;;  %v1132_v15 = vpop.f32.mrf.mxu3 }
 0x22f   : > { %v1117_v26 = vpop.f32.mrf.mxu1  ;;  %v1076_v29 = vpop.f32.mrf.mxu0 }
 0x233   : > { %v3414_v16 = vpop.f32.mrf.mxu2  ;;  %v3416_v17 = vpop.f32.mrf.mxu3 }
 0x237   : > { %v1120_v38 = vpop.f32.mrf.mxu1  ;;  %v1079_v41 = vpop.f32.mrf.mxu0 }
 0x23b   : > { %v1180_v20 = vpop.f32.mrf.mxu2  ;;  %v1221_v21 = vpop.f32.mrf.mxu3 }
 0x23f   : > { %v1123_v45 = vpop.f32.mrf.mxu1  ;;  %v1082_v46 = vpop.f32.mrf.mxu0 }
 0x243   : > { %v1183_v24 = vpop.f32.mrf.mxu2  ;;  %v1224_v25 = vpop.f32.mrf.mxu3 }
 0x244   : > { %v1184_v11 = vadd.f32 %v1183_v24, %v1076_v29  ;;  %v1219_v24 = vadd.f32 %v3416_v17, %v3418_v18 }
 0x247   : > { %v1126_v51 = vpop.f32.mrf.mxu1  ;;  %v1085_v52 = vpop.f32.mrf.mxu0 }
 0x24b   : > { %v1186_v27 = vpop.f32.mrf.mxu2  ;;  %v1227_v28 = vpop.f32.mrf.mxu3 }
 0x24c   : > { %v1187_v5 = vadd.f32 %v1186_v27, %v1079_v41  ;;  %v1228_v6 = vadd.f32 %v1227_v28, %v1120_v38  ;;  %v1178_v41 = vadd.f32 %v3414_v16, %v3420_v19 }
 0x24e   : > { %v1296_v28 = vadd.f32 %v1268_v4, %v1187_v5  ;;  %v1297_v38 = vadd.f32 %v1268_v4, %v1228_v6 }
 0x253   : > { %v1189_v30 = vpop.f32.mrf.mxu2  ;;  %v1230_v33 = vpop.f32.mrf.mxu3 }
 0x254   : > { %v1231_v62 = vadd.f32 %v1230_v33, %v1123_v45  ;;  %v1190_v63 = vadd.f32 %v1189_v30, %v1082_v46  ;;  %v1181_v30 = vadd.f32 %v1180_v20, %v1073_v23  ;;  %v1312_v45 = vmax.f32 %v1296_v28, 0.0 }
 0x255   : > { %v1313_v46 = vmax.f32 %v1297_v38, 0.0 }
 0x256   : > { %v1299_v33 = vadd.f32 %v1273_v53, %v1231_v62 }
 0x25b   : > { %v1192_v42 = vpop.f32.mrf.mxu2  ;;  %v1233_v43 = vpop.f32.mrf.mxu3 }
 0x25c   : > { %v1234_v58 = vadd.f32 %v1233_v43, %v1126_v51  ;;  %v1193_v59 = vadd.f32 %v1192_v42, %v1085_v52  ;;  %v1222_v42 = vadd.f32 %v1221_v21, %v1114_v22  ;;  %v1263_v43 = vpop.permute.xlu1 %1262  ;;  %v1315_v21 = vmax.f32 %v1299_v33, 0.0  ;;  %v1322_v52 = vld [vmem:[%s3581_s7] sm:$0xff] }
 0x25e   : > { %v1300_v9 = vadd.f32 %v1278_v47, %v1193_v59  ;;  %v1301_v10 = vadd.f32 %v1278_v47, %v1234_v58  ;;  %v1253_v47 = vpop.permute.xlu0 %1252 }
 0x25f   : > { %v1291_v17 = vadd.f32 %v1253_v47, %v1219_v24 }
 0x260   : > { %v1317_v27 = vmax.f32 %v1301_v10, 0.0 }
 0x261   : > { %v1307_v51 = vmax.f32 %v1291_v17, 0.0 }
 0x263   : > { %v1195_v48 = vpop.f32.mrf.mxu2  ;;  %v1236_v49 = vpop.f32.mrf.mxu3 }
 0x264   : > { %v1196_v54 = vadd.f32 %v1195_v48, %v1088_v12  ;;  %v1237_v55 = vadd.f32 %v1236_v49, %v1129_v13  ;;  %v1225_v12 = vadd.f32 %v1224_v25, %v1117_v26  ;;  %v1258_v25 = vpop.permute.xlu2 %1257  ;;  %v1294_v26 = vadd.f32 %v1263_v43, %v1184_v11 }
 0x265   : > { %v1292_v22 = vadd.f32 %v1258_v25, %v1181_v30  ;;  %v1293_v23 = vadd.f32 %v1258_v25, %v1222_v42  ;;  %v1290_v48 = vadd.f32 %v1253_v47, %v1178_v41 }
 0x266   : > { %v1302_v2 = vadd.f32 %v1283_v50, %v1196_v54  ;;  %v1303_v3 = vadd.f32 %v1283_v50, %v1237_v55  ;;  %v1295_v29 = vadd.f32 %v1263_v43, %v1225_v12  ;;  %v1310_v16 = vmax.f32 %v1294_v26, 0.0  ;;  %v1324_v54 = vld [vmem:[%s3581_s7 + $0x10] sm:$0xff]  ;;  %v1325_v55 = vld [vmem:[%s3581_s7 + $0x18] sm:$0xff] }
 0x267   : > { %v1308_v18 = vmax.f32 %v1292_v22, 0.0  ;;  %v1309_v49 = vmax.f32 %v1293_v23, 0.0  ;;  %v1306_v50 = vmax.f32 %v1290_v48, 0.0  ;;  %v1485_v48 = vlaneseq }
 0x268   : > { %v1318_v13 = vmax.f32 %v1302_v2, 0.0  ;;  %v1311_v19 = vmax.f32 %v1295_v29, 0.0 }
 0x269   : > { %vm1487_vm4 = vcmp.lt.s32.totalorder %v1485_v48, 256 }
 0x26b   : > { %v1198_v56 = vpop.f32.mrf.mxu2  ;;  %v1239_v57 = vpop.f32.mrf.mxu3 }
 0x26c   : > { %v1199_v60 = vadd.f32 %v1198_v56, %v1091_v14  ;;  %v1240_v61 = vadd.f32 %v1239_v57, %v1132_v15  ;;  %v1319_v14 = vmax.f32 %v1303_v3, 0.0  ;;  %v1298_v15 = vadd.f32 %v1273_v53, %v1190_v63  ;;  %v1323_v53 = vld [vmem:[%s3581_s7 + $0x8] sm:$0xff]  ;;  %v1326_v56 = vld [vmem:[%s3581_s7 + $0x20] sm:$0xff]  ;;  %v1335_v57 = vpop.permute.xlu1 %1334 }
 0x26e   : > { %v1304_v0 = vadd.f32 %v1288_v44, %v1199_v60  ;;  %v1305_v1 = vadd.f32 %v1288_v44, %v1240_v61  ;;  %v1316_v44 = vmax.f32 %v1300_v9, 0.0  ;;  %v1314_v20 = vmax.f32 %v1298_v15, 0.0 }
 0x270   : > { %v1320_v7 = vmax.f32 %v1304_v0, 0.0  ;;  %v1321_v8 = vmax.f32 %v1305_v1, 0.0  ;;  %v1340_v0 = vpop.permute.xlu2 %1339 }
 0x272   : > { %1381 = vmatpush.msrb.mxu0 %v1320_v7  ;;  %1413 = vmatpush.msrb.mxu1 %v1321_v8  ;;  %v1345_v7 = vpop.permute.xlu0 %1344 }
 0x274   : > { %1382 = vmatpush.msrb.mxu0 %v1318_v13  ;;  %1414 = vmatpush.msrb.mxu1 %v1319_v14 }
 0x276   : > { %1383 = vmatpush.msrb.mxu0 %v1316_v44  ;;  %1415 = vmatpush.msrb.mxu1 %v1317_v27  ;;  %v1350_v44 = vpop.permute.xlu1 %1349 }
 0x278   : > { %1384 = vmatpush.msrb.mxu0 %v1314_v20  ;;  %1416 = vmatpush.msrb.mxu1 %v1315_v21  ;;  %v1355_v47 = vpop.permute.xlu2 %1354 }
 0x27a   : > { %1385 = vmatpush.msrb.mxu0 %v1312_v45  ;;  %1417 = vmatpush.msrb.mxu1 %v1313_v46  ;;  %v1460_v38 = vpop.permute.xlu0 %1459 }
 0x27c   : > { %1386 = vmatpush.msrb.mxu0 %v1310_v16  ;;  %1418 = vmatpush.msrb.mxu1 %v1311_v19 }
 0x27e   : > { %1387 = vmatpush.msrb.mxu0 %v1308_v18  ;;  %1419 = vmatpush.msrb.mxu1 %v1309_v49 }
 0x280   : > { %1388 = vmatpush.msrb.mxu0 %v1306_v50  ;;  %1420 = vmatpush.msrb.mxu1 %v1307_v51 }
 0x281   : > { %1927 = vmatmul.msk.f32.vlgmr.msrb.gmra.mxu0 %vm1357_vm2, %v1322_v52  ;;  %1932 = vmatmul.msk.f32.vlgmr.msrb.gmra.mxu1 %vm1357_vm2, %v1322_v52 }
 0x289   : > { %1928 = vmatmul.msk.f32.gmra.mxu0 %vm1357_vm2, %v1323_v53  ;;  %1933 = vmatmul.msk.f32.gmra.mxu1 %vm1357_vm2, %v1323_v53 }
 0x291   : > { %1929 = vmatmul.msk.f32.gmra.mxu0 %vm1357_vm2, %v1324_v54  ;;  %1934 = vmatmul.msk.f32.gmra.mxu1 %vm1357_vm2, %v1324_v54 }
 0x299   : > { %1930 = vmatmul.msk.f32.gmra.mxu0 %vm1357_vm2, %v1325_v55  ;;  %1935 = vmatmul.msk.f32.gmra.mxu1 %vm1357_vm2, %v1325_v55 }
 0x2a1   : > { %1931 = vmatmul.msk.f32.gmra.mxu0 %vm1357_vm2, %v1326_v56  ;;  %1936 = vmatmul.msk.f32.gmra.mxu1 %vm1357_vm2, %v1326_v56 }
 0x2fe   : > { %v1390_v58 = vpop.f32.mrf.mxu0  ;;  %v1422_v59 = vpop.f32.mrf.mxu1 }
 0x2ff   : > { %v1391_v60 = vadd.f32 %v1390_v58, %v1335_v57  ;;  %v1423_v61 = vadd.f32 %v1422_v59, %v1335_v57 }
 0x301   : > { %v1441_v62 = vsub.f32 0.0, %v1391_v60  ;;  %v1442_v63 = vsub.f32 0.0, %v1423_v61 }
 0x303   : > { %v1445_v3 = vmul.f32 1.442695, %v1441_v62  ;;  %v1447_v5 = vmul.f32 1.442695, %v1442_v63 }
 0x305   : > { %2275 = vpow2.f32 %v1445_v3 }
 0x306   : > { %v1393_v1 = vpop.f32.mrf.mxu0  ;;  %v1425_v2 = vpop.f32.mrf.mxu1  ;;  %2277 = vpow2.f32 %v1447_v5 }
 0x307   : > { %v1394_v4 = vadd.f32 %v1393_v1, %v1340_v0  ;;  %v1426_v6 = vadd.f32 %v1425_v2, %v1340_v0 }
 0x309   : > { %v1443_v8 = vsub.f32 0.0, %v1394_v4  ;;  %v1444_v9 = vsub.f32 0.0, %v1426_v6 }
 0x30b   : > { %v1449_v12 = vmul.f32 1.442695, %v1443_v8  ;;  %v1451_v15 = vmul.f32 1.442695, %v1444_v9  ;;  %v2276_v33 = vpop.eup %2275 }
 0x30c   : > { %v2278_v43 = vpop.eup %2277 }
 0x30d   : > { %2279 = vpow2.f32 %v1449_v12 }
 0x30e   : > { %v1396_v10 = vpop.f32.mrf.mxu0  ;;  %v1428_v11 = vpop.f32.mrf.mxu1  ;;  %2281 = vpow2.f32 %v1451_v15 }
 0x30f   : > { %v1397_v13 = vadd.f32 %v1396_v10, %v1345_v7  ;;  %v1429_v14 = vadd.f32 %v1428_v11, %v1345_v7 }
 0x311   : > { %v1437_v30 = vsub.f32 %v3287_v36, %v1397_v13  ;;  %v1438_v42 = vsub.f32 %v3289_v37, %v1429_v14 }
 0x313   : > { %v1453_v27 = vmul.f32 %v2276_v33, %v1437_v30  ;;  %v1454_v28 = vmul.f32 %v2278_v43, %v1438_v42  ;;  %v2280_v37 = vpop.eup %2279 }
 0x314   : > { %v2282_v45 = vpop.eup %2281 }
 0x315   : > { %v1467_v41 = vmul.f32 %v1460_v38, %v1453_v27  ;;  %v1468_v24 = vmul.f32 %v1460_v38, %v1454_v28 }
 0x316   : > { %v1399_v25 = vpop.f32.mrf.mxu0  ;;  %v1431_v26 = vpop.f32.mrf.mxu1 }
 0x317   : > { %v1471_v29 = vadd.f32 %v1467_v41, %v3292_v39  ;;  %v1472_v20 = vadd.f32 %v1468_v24, %v3295_v40  ;;  %v1400_v21 = vadd.f32 %v1399_v25, %v1350_v44  ;;  %v1432_v36 = vadd.f32 %v1431_v26, %v1350_v44  ;;  %v1465_v40 = vpop.permute.xlu1 %1464 }
 0x319   : > { %1475 = vst [vmem:[%s3457_s18] sm:$0xff] %v1471_v29  ;;  %v1439_v22 = vsub.f32 %v3272_v31, %v1400_v21  ;;  %v1440_v23 = vsub.f32 %v3274_v32, %v1432_v36 }
 0x31a   : > { %1476 = vst [vmem:[%s3457_s18 + $0x8] sm:$0xff] %v1472_v20 }
 0x31b   : > { %v1455_v39 = vmul.f32 %v2280_v37, %v1439_v22  ;;  %v1456_v46 = vmul.f32 %v2282_v45, %v1440_v23 }
 0x31d   : > { %v1469_v16 = vmul.f32 %v1465_v40, %v1455_v39  ;;  %v1470_v19 = vmul.f32 %v1465_v40, %v1456_v46 }
 0x31e   : > { %v1402_v17 = vpop.f32.mrf.mxu0  ;;  %v1434_v18 = vpop.f32.mrf.mxu1 }
 0x31f   : > { %v1473_v31 = vadd.f32 %v1469_v16, %v3277_v34  ;;  %v1474_v32 = vadd.f32 %v1470_v19, %v3280_v35  ;;  %v1435_v49 = vadd.f32 %v1434_v18, %v1355_v47  ;;  %v1403_v50 = vadd.f32 %v1402_v17, %v1355_v47 }
 0x320   : > { %1502 = sbr.rel (!%p2764_p6) target bundleno = 837 (0x345), region = 192 }
 0x321   : > { %1477 = vst [vmem:[%s3457_s18 + $0x10] sm:$0xff] %v1473_v31  ;;  %v1481_v51 = vrot.slane %v1435_v49, 7 }
 0x322   : > { %1478 = vst [vmem:[%s3457_s18 + $0x18] sm:$0xff] %v1474_v32 }
 0x323   : > { %v1483_v52 = vsel %vm1482_vm3, %v1403_v50, %v1481_v51 }
 0x324   : > { %1489 = vst.msk [vmem:[%s3468_s0] sm:$0x3] %vm1487_vm4, %v1483_v52 }
 0x325   : > { %s3673_s29 = smov (!%p1505_p3, %s1504_s29), 2 }
 0x326   : > { %s1940_s17 = sshll.u32 %s3673_s29, 4 }
 0x327   : > { %s1508_s24 = ssub.s32 32, %s1940_s17 }
 0x328   : > { %s1509_s12 = sshll.u32 %s1508_s24, 4 }
 0x329   : > { %1510 = vsyncadd %s1491_s30, %s1509_s12  ;;  %p3481_p4 = scmp.ne.s32.totalorder %s1940_s17, 0  ;;  %s1960_s19 = sshll.u32 %s3636_s21, 4 }
 0x32a   : > { %s3638_s26 = sld [smem:[#allocation17_spill]]  ;;  %s1943_s27 = sshll.u32 %s3673_s29, 3 }
 0x32b   : > { %s1516_s20 = sshll.u32 %s3457_s18, 4  ;;  %s3595_s11 = sshll.u32 %s3673_s29, 8  ;;  %s3491_s20 = int_to_ptr.vmem [resolvable:$true] %s1516_s20 }
 0x32c   : > { %s2283_s24 = sshra.s32 %s3491_s20, 4  ;;  %s2285_s17 = sshrl.u32 %s3595_s11, 4  ;;  %s2284_s24 = int_to_ptr.vmem [resolvable:$true] %s2283_s24 }
 0x32d   : > { %s2290_s12 = scalar_lea.vmem %s2284_s24, %s2285_s17  ;;  %s2662_s21 = smov [#allocation4]  }
 0x32e   : > { %p2291_p5 = scmp.ne.s32.totalorder %s2284_s24, %s2290_s12 }
 0x330   : > { %s1513_s28 = scalar_lea.hbm %s3638_s26, %s1960_s19  ;;  %p2292_p7 = pnand %p2291_p5, %p3481_p4 }
 0x331   : > { %s1518_s13 = sshll.u32 %s1513_s28, 4  ;;  %s2294_s19 = scalar_lea.vmem %s2662_s21, 64  ;;  %s3493_s13 = int_to_ptr.hbm [resolvable:$true] %s1518_s13 }
 0x332   : > { %p2293_p10 = pneg %p2292_p7  ;;  %p2296_p11 = scmp.lt.s32.totalorder %s2294_s19, %s2290_s12 }
 0x334   : > { %p2298_p12 = pnand %p2296_p11, %p2293_p10 }
 0x336   : > { %2301 = shalt.err (!%p2298_p12)
}
 0x337   : > { %s2302_s18 = sshra.s32 %s3493_s13, 4  ;;  %s2313_s24 = scalar_lea.hbm %s3638_s26, 48  ;;  %s2303_s18 = int_to_ptr.hbm [resolvable:$true] %s2302_s18 }
 0x338   : > { %s2309_s22 = scalar_lea.hbm %s2303_s18, %s2285_s17  ;;  %p2314_p2 = scmp.lt.s32.totalorder %s2303_s18, %s3638_s26 }
 0x339   : > { %p2310_p13 = scmp.ne.s32.totalorder %s2303_s18, %s2309_s22  ;;  %p2315_p3 = scmp.lt.s32.totalorder %s2313_s24, %s2309_s22 }
 0x33b   : > { %p2311_p0 = pnand %p2310_p13, %p3481_p4  ;;  %p2316_p5 = por %p2315_p3, %p2314_p2 }
 0x33d   : > { %p2312_p1 = pneg %p2311_p0 }
 0x33f   : > { %p2317_p7 = pnand %p2316_p5, %p2312_p1 }
 0x341   : > { %2320 = shalt.err (!%p2317_p7)
}
 0x342   : > { %s2663_s12 = smov 256   ;;  %s2664_s17 = smov 384  }
 0x343   : > { %s3639_s21 = sshll.u32 %s3673_s29, 8 }
 0x344   : > { %1524 = dma.vmem_to_hbm [thread:$0]  (%p3481_p4), %s3491_s20, %s3639_s21, %s3493_s13, %s1491_s30, %s2663_s12, %s2664_s17, %s1943_s27  }
 0x345 PF: > { %1527 = sbr.rel (!%p2764_p6) target bundleno = 876 (0x36c), region = 196  ;;  %s3641_s11 = sld [smem:[#allocation11_spill]] (%p2764_p6) }
 0x346   : > { %s3642_s28 = scalar_lea.sflag (%p2764_p6), [#allocation7], %s3252_s10 }
 0x34b   : > { %s1946_s19 = sshll.u32 %s3641_s11, 1 }
 0x34c   : > { %s1529_s18 = ssub.s32 3, %s1946_s19 }
 0x34d   : > { %p1530_p10 = scmp.lt.s32.totalorder %s1529_s18, 2 }
 0x34f   : > { %s3675_s18 = smov (!%p1530_p10, %s1529_s18), 2 }
 0x350   : > { %s1532_s22 = ssub.s32 2, %s3675_s18 }
 0x351   : > { %s1533_s23 = sshll.u32 %s1532_s22, 4 }
 0x352   : > { %1534 = vsyncadd %s3642_s28, %s1533_s23  ;;  %p1947_p4 = scmp.ne.s32.totalorder %s3675_s18, 0  ;;  %s3643_s25 = sld [smem:[#allocation18_spill]] }
 0x353   : > { %s1537_s20 = sshll.u32 %s3675_s18, 4  ;;  %s1538_s13 = sshll.u32 %s3468_s0, 4  ;;  %s3534_s13 = int_to_ptr.vmem [resolvable:$true] %s1538_s13 }
 0x354   : > { %s2322_s12 = sshra.s32 %s3534_s13, 4  ;;  %s2324_s17 = sshrl.u32 %s1537_s20, 4  ;;  %s2323_s12 = int_to_ptr.vmem [resolvable:$true] %s2322_s12 }
 0x355   : > { %s2329_s21 = scalar_lea.vmem %s2323_s12, %s2324_s17  ;;  %s2665_s9 = smov [#allocation6]  }
 0x356   : > { %p2330_p6 = scmp.ne.s32.totalorder %s2323_s12, %s2329_s21  ;;  %s2333_s11 = scalar_lea.vmem %s2665_s9, 4 }
 0x357   : > { %p2335_p13 = scmp.lt.s32.totalorder %s2333_s11, %s2329_s21 }
 0x358   : > { %s1536_s27 = scalar_lea.hbm %s3643_s25, %s1946_s19  ;;  %p2331_p11 = pnand %p2330_p6, %p1947_p4 }
 0x359   : > { %s1540_s24 = sshll.u32 %s1536_s27, 4  ;;  %s1541_s24 = int_to_ptr.hbm [resolvable:$true] %s1540_s24 }
 0x35a   : > { %p2332_p12 = pneg %p2331_p11 }
 0x35c   : > { %p2337_p0 = pnand %p2335_p13, %p2332_p12 }
 0x35e   : > { %2340 = shalt.err (!%p2337_p0)
}
 0x35f   : > { %s2341_s0 = sshra.s32 %s1541_s24, 4  ;;  %s2352_s28 = scalar_lea.hbm %s3643_s25, 3  ;;  %s2342_s0 = int_to_ptr.hbm [resolvable:$true] %s2341_s0 }
 0x360   : > { %s2348_s19 = scalar_lea.hbm %s2342_s0, %s2324_s17  ;;  %p2353_p5 = scmp.lt.s32.totalorder %s2342_s0, %s3643_s25 }
 0x361   : > { %p2349_p1 = scmp.ne.s32.totalorder %s2342_s0, %s2348_s19  ;;  %p2354_p7 = scmp.lt.s32.totalorder %s2352_s28, %s2348_s19 }
 0x363   : > { %p2350_p2 = pnand %p2349_p1, %p1947_p4  ;;  %p2355_p10 = por %p2354_p7, %p2353_p5 }
 0x365   : > { %p2351_p3 = pneg %p2350_p2 }
 0x367   : > { %p2356_p6 = pnand %p2355_p10, %p2351_p3 }
 0x369   : > { %2359 = shalt.err (!%p2356_p6)
}
 0x36a   : > { %s3644_s27 = scalar_lea.sflag [#allocation7], %s3252_s10 }
 0x36b   : > { %1543 = dma.vmem_to_hbm [thread:$0]  (%p1947_p4), %s3534_s13, %s1537_s20, %s1541_s24, %s3644_s27  }
 0x36c PF: > { %s3645_s12 = sld [smem:[#allocation10_spill]]  ;;  %p1970_p11 = pnand %p1831_p9, %p2768_p8 }
 0x36e   : > { %p1971_p12 = pneg %p1970_p11 }
 0x372   : > { %s1552_s21 = sand.u32 1, %s3645_s12  }
 0x373   : > { %s1553_s9 = scalar_lea.sflag [#allocation5], %s1552_s21 }
 0x374   : > { %2506 = dma.done.wait (%p1971_p12), %s1553_s9, 512  }
 0x375   : > { %2508 = vsyncadd (%p1971_p12), %s1553_s9, 4294966784  ;;  %s1563_s11 = scalar_lea.sflag [#allocation7], %s1552_s21 }
 0x376   : > { %2510 = dma.done.wait (%p1971_p12), %s1563_s11, 32  }
 0x377   : > { %2512 = vsyncadd (%p1971_p12), %s1563_s11, 4294967264  ;;  %s3647_s16 = sld [smem:[#allocation12_spill]]  ;;  %s3649_s13 = smov %s2519_s14 }
 0x378   : > { %s3648_s10 = sld [smem:[#allocation13_spill]]  ;;  %s3650_s14 = smov %s2523_s15 }
 0x37d   : > { %p24_p4 = scmp.ge.s32.totalorder %s3647_s16, 4  }
 0x37e   : > { %s3651_s15 = smov %s3648_s10 }
 0x37f   :  { %26 = sbr.rel (!%p24_p4) target bundleno = 9 (0x9), region = 377 }
 0x384   :  { %1569 = vsyncpa [#allocation5], 1 }
 0x385   :  { %1571 = vsyncpa [#allocation5 + $0x1], 1 }
 0x386   :  { %1572 = vsyncpa [#allocation7], 1 }
 0x387   :  { %1574 = vsyncpa [#allocation7 + $0x1], 1 }

</bundles_post_ra>
